<compile_context>
chip_gen: v5e
topology: v5e:2x2
jax: 0.10.0
libtpu: 0.0.40
codegen_flags: <defaults>
</compile_context>

<pallas_src>
import functools

import jax
import jax.numpy as jnp
from jax.experimental import pallas as pl
from jax.experimental.pallas import tpu as pltpu

_HIDDEN = 512
_VMEM_BUDGET = 32 * 1024 * 1024          # target working set (all generations)
_VMEM_LIMIT_BYTES = 48 * 1024 * 1024     # explicit scoped-VMEM limit (< v7x 64 MiB)


def _round_up(n, m):
    return ((n + m - 1) // m) * m


def _vmem_bytes(tm, d, h, c_pad):
    """Rough VMEM working-set estimate for a batch tile of `tm` rows."""
    x_buf = 2 * tm * d * 4                       # double-buffered f32 x tile
    out_buf = 2 * tm * c_pad * 4                 # double-buffered f32 out tile
    weights = d * h * 2 + h * c_pad * 2 + h * 4 + c_pad * 4   # single-buffered
    scratch = tm * d * 2 + tm * h * 6 + tm * c_pad * 4        # compute temporaries
    return x_buf + out_buf + weights + scratch


def _choose_tm(b, d, h, c_pad):
    """Batch-tile rows: as large as the VMEM budget allows, megacore-aware."""
    tm = 2048
    while tm > 8 and _vmem_bytes(tm, d, h, c_pad) > _VMEM_BUDGET:
        tm //= 2
    if b >= 16:
        # Give the two v7x TensorCores at least two tiles to shard.
        tm = min(tm, _round_up(pl.cdiv(b, 2), 8))
    if b >= 8:
        # Never (much) larger than the batch itself.
        tm = min(tm, (b // 8) * 8)
    return max(tm, 8)


def _simpler_nn_kernel(x_ref, w1_ref, b1_ref, w2_ref, b2_ref, o_ref):
    # In-kernel f32 -> bf16 cast (VPU, hidden under DMA/MXU); fc1 on the MXU
    # with f32 accumulation.
    x = x_ref[...].astype(jnp.bfloat16)
    h = jnp.dot(x, w1_ref[...], preferred_element_type=jnp.float32)
    # Bias + ReLU in f32 (safe on v5e's VPU); Dropout(0.25) is identity in eval.
    h = jnp.maximum(h + b1_ref[...], 0.0)
    # fc2 on the MXU, lane-dense 128-wide padded output, f32 accumulation.
    out = jnp.dot(h.astype(jnp.bfloat16), w2_ref[...],
                  preferred_element_type=jnp.float32)
    o_ref[...] = (out + b2_ref[...]).astype(o_ref.dtype)


def prepare_params(w1, b1, w2, b2):
    """One-time weight preparation (bf16 cast + lane-dense pad). Cache/reuse."""
    h = w1.shape[1]
    c = w2.shape[1]
    c_pad = _round_up(max(c, 128), 128)
    w1_bf16 = w1.astype(jnp.bfloat16)
    w2_pad = jnp.pad(w2, ((0, 0), (0, c_pad - c))).astype(jnp.bfloat16)
    b1_2d = b1.reshape(1, h).astype(jnp.float32)
    b2_pad = jnp.pad(b2.reshape(1, c), ((0, 0), (0, c_pad - c))).astype(jnp.float32)
    return (w1_bf16, b1_2d, w2_pad, b2_pad)


def simpler_nn_forward(x_nchw, prepared, num_classes):
    """x_nchw: (B, 3, H, W) float32. Returns (B, num_classes) float32."""
    w1, b1, w2, b2 = prepared
    B = x_nchw.shape[0]
    x_flat = x_nchw.reshape(B, -1)           # same memory order as torch .view
    D = x_flat.shape[1]
    H = w1.shape[1]                          # 512
    C_pad = w2.shape[1]                      # lane-dense padded num_classes

    # Degenerate tiny batches: pad up to one sublane (a few rows only).
    B_eff = B
    if B < 8:
        x_flat = jnp.pad(x_flat, ((0, 8 - B), (0, 0)))
        B_eff = 8

    TM = _choose_tm(B_eff, D, H, C_pad)
    num_tiles = pl.cdiv(B_eff, TM)
    B_out = num_tiles * TM                   # block-padded output rows (in-bounds stores)

    resident = functools.partial(pl.BlockSpec, index_map=lambda i: (0, 0),
                                 pipeline_mode=pl.Buffered(1))

    out_pad = pl.pallas_call(
        _simpler_nn_kernel,
        out_shape=jax.ShapeDtypeStruct((B_out, C_pad), jnp.float32),
        grid_spec=pltpu.PrefetchScalarGridSpec(
            num_scalar_prefetch=0,
            grid=(num_tiles,),
            in_specs=[
                pl.BlockSpec((TM, D), lambda i: (i, 0)),   # x tile (double-buffered)
                resident((D, H)),                          # w1 resident, single buffer
                resident((1, H)),                          # b1
                resident((H, C_pad)),                      # w2
                resident((1, C_pad)),                      # b2
            ],
            out_specs=pl.BlockSpec((TM, C_pad), lambda i: (i, 0)),
        ),
        compiler_params=pltpu.CompilerParams(
            dimension_semantics=("parallel",),             # shard batch tiles across TCs
            vmem_limit_bytes=_VMEM_LIMIT_BYTES,
        ),
    )(x_flat, w1, b1, w2, b2)

    return out_pad[:B, :num_classes]


def init_params(key, flattened_dim, hidden=_HIDDEN, num_classes=10):
    """Deterministic parameter init (PyTorch-Linear-style uniform bounds)."""
    k1, k2, k3, k4 = jax.random.split(key, 4)
    bound1 = 1.0 / jnp.sqrt(flattened_dim)
    bound2 = 1.0 / jnp.sqrt(hidden)
    w1 = jax.random.uniform(k1, (flattened_dim, hidden), jnp.float32, -bound1, bound1)
    b1 = jax.random.uniform(k2, (hidden,), jnp.float32, -bound1, bound1)
    w2 = jax.random.uniform(k3, (hidden, num_classes), jnp.float32, -bound2, bound2)
    b2 = jax.random.uniform(k4, (num_classes,), jnp.float32, -bound2, bound2)
    return w1, b1, w2, b2


if __name__ == "__main__":
    # Small shapes consistent with the module: B=2, C_in=3, spatial=16x16,
    # flattened_dim = 3*16*16 = 768, hidden = 512, num_classes = 10.
    B, CIN, S = 2, 3, 16
    num_classes = 10
    flattened_dim = CIN * S * S

    key = jax.random.PRNGKey(0)
    kx, kp = jax.random.split(key)
    x = jax.random.normal(kx, (B, CIN, S, S), jnp.float32)
    w1, b1, w2, b2 = init_params(kp, flattened_dim, hidden=_HIDDEN,
                                 num_classes=num_classes)

    prepared = prepare_params(w1, b1, w2, b2)      # hoisted, one-time weight prep
    fwd = jax.jit(simpler_nn_forward, static_argnums=(2,))

    out = jax.block_until_ready(fwd(x, prepared, num_classes))
    assert out.shape == (B, num_classes)

    # Reference 1: bf16-operand / f32-accumulate (matches kernel numerics).
    x_flat = x.reshape(B, -1)
    h_ref = jnp.maximum(
        jnp.dot(x_flat.astype(jnp.bfloat16), w1.astype(jnp.bfloat16),
                preferred_element_type=jnp.float32) + b1, 0.0)
    ref_bf16 = jnp.dot(h_ref.astype(jnp.bfloat16), w2.astype(jnp.bfloat16),
                       preferred_element_type=jnp.float32) + b2
    assert jnp.allclose(out, ref_bf16, atol=2e-2, rtol=2e-2)

    # Reference 2: full-f32 PyTorch-equivalent forward (loose tolerance due to
    # bf16 matmul operands).
    ref_f32 = jnp.maximum(x_flat @ w1 + b1, 0.0) @ w2 + b2
    assert jnp.allclose(out, ref_f32, atol=1e-1, rtol=5e-2)

    print("KERNEL_OK")
</pallas_src>

<mosaic_0001>
module attributes {stable_mosaic.version = 11 : i64} {
  func.func @_simpler_nn_kernel(%arg0: i32, %arg1: memref<8x768xf32, #tpu.memory_space<vmem>>, %arg2: memref<768x512xbf16, #tpu.memory_space<vmem>>, %arg3: memref<1x512xf32, #tpu.memory_space<vmem>>, %arg4: memref<512x128xbf16, #tpu.memory_space<vmem>>, %arg5: memref<1x128xf32, #tpu.memory_space<vmem>>, %arg6: memref<8x128xf32, #tpu.memory_space<vmem>>) attributes {dimension_semantics = [#tpu.dimension_semantics<parallel>], iteration_bounds = array<i64: 1>, scalar_prefetch = 0 : i64, scratch_operands = 0 : i64, tpu.core_type = #tpu.core_type<tc>, window_params = [{transform_indices = @transform_0, window_bounds = array<i64: 8, 768>}, {pipeline_mode = #tpu.pipeline_mode<synchronous>, transform_indices = @transform_1, window_bounds = array<i64: 768, 512>}, {pipeline_mode = #tpu.pipeline_mode<synchronous>, transform_indices = @transform_2, window_bounds = array<i64: 1, 512>}, {pipeline_mode = #tpu.pipeline_mode<synchronous>, transform_indices = @transform_3, window_bounds = array<i64: 512, 128>}, {pipeline_mode = #tpu.pipeline_mode<synchronous>, transform_indices = @transform_4, window_bounds = array<i64: 1, 128>}, {transform_indices = @transform_5, window_bounds = array<i64: 8, 128>}]} {
    %c0 = arith.constant 0 : index
    %c0_0 = arith.constant 0 : index
    %0 = vector.load %arg1[%c0, %c0_0] : memref<8x768xf32, #tpu.memory_space<vmem>>, vector<8x768xf32>
    %1 = arith.truncf %0 : vector<8x768xf32> to vector<8x768xbf16>
    %c0_1 = arith.constant 0 : index
    %c0_2 = arith.constant 0 : index
    %2 = vector.load %arg2[%c0_1, %c0_2] : memref<768x512xbf16, #tpu.memory_space<vmem>>, vector<768x512xbf16>
    %cst = arith.constant dense<0.000000e+00> : vector<8x512xf32>
    %3 = tpu.matmul %1, %2, %cst {dimension_numbers = #tpu.dot_dimension_numbers<[1], [0], [0], [1], [0, 0, 1, 1], [], []>} : vector<8x768xbf16>, vector<768x512xbf16>, vector<8x512xf32> -> vector<8x512xf32>
    %c0_3 = arith.constant 0 : index
    %c0_4 = arith.constant 0 : index
    %4 = vector.load %arg3[%c0_3, %c0_4] : memref<1x512xf32, #tpu.memory_space<vmem>>, vector<1x512xf32>
    %5 = vector.broadcast %4 : vector<1x512xf32> to vector<8x512xf32>
    %6 = arith.addf %3, %5 : vector<8x512xf32>
    %cst_5 = arith.constant 0.000000e+00 : f32
    %7 = vector.broadcast %cst_5 : f32 to vector<8x512xf32>
    %8 = arith.maximumf %6, %7 : vector<8x512xf32>
    %9 = arith.truncf %8 : vector<8x512xf32> to vector<8x512xbf16>
    %c0_6 = arith.constant 0 : index
    %c0_7 = arith.constant 0 : index
    %10 = vector.load %arg4[%c0_6, %c0_7] : memref<512x128xbf16, #tpu.memory_space<vmem>>, vector<512x128xbf16>
    %cst_8 = arith.constant dense<0.000000e+00> : vector<8x128xf32>
    %11 = tpu.matmul %9, %10, %cst_8 {dimension_numbers = #tpu.dot_dimension_numbers<[1], [0], [0], [1], [0, 0, 1, 1], [], []>} : vector<8x512xbf16>, vector<512x128xbf16>, vector<8x128xf32> -> vector<8x128xf32>
    %c0_9 = arith.constant 0 : index
    %c0_10 = arith.constant 0 : index
    %12 = vector.load %arg5[%c0_9, %c0_10] : memref<1x128xf32, #tpu.memory_space<vmem>>, vector<1x128xf32>
    %13 = vector.broadcast %12 : vector<1x128xf32> to vector<8x128xf32>
    %14 = arith.addf %11, %13 : vector<8x128xf32>
    %c0_11 = arith.constant 0 : index
    %c0_12 = arith.constant 0 : index
    %15 = vector.load %arg6[%c0_11, %c0_12] : memref<8x128xf32, #tpu.memory_space<vmem>>, vector<8x128xf32>
    tpu.vector_store %arg6[%c0_11, %c0_12], %14 {strides = array<i32>} : memref<8x128xf32, #tpu.memory_space<vmem>>, vector<8x128xf32>,
    return
  }
  func.func @transform_0(%arg0: i32) -> (i32, i32) {
    %c0_i32 = arith.constant 0 : i32
    %c0_i32_0 = arith.constant 0 : i32
    return %arg0, %c0_i32 : i32, i32
  }
  func.func @transform_1(%arg0: i32) -> (i32, i32) {
    %c0_i32 = arith.constant 0 : i32
    %c0_i32_0 = arith.constant 0 : i32
    %c0_i32_1 = arith.constant 0 : i32
    return %c0_i32, %c0_i32_0 : i32, i32
  }
  func.func @transform_2(%arg0: i32) -> (i32, i32) {
    %c0_i32 = arith.constant 0 : i32
    %c0_i32_0 = arith.constant 0 : i32
    %c0_i32_1 = arith.constant 0 : i32
    return %c0_i32, %c0_i32_0 : i32, i32
  }
  func.func @transform_3(%arg0: i32) -> (i32, i32) {
    %c0_i32 = arith.constant 0 : i32
    %c0_i32_0 = arith.constant 0 : i32
    %c0_i32_1 = arith.constant 0 : i32
    return %c0_i32, %c0_i32_0 : i32, i32
  }
  func.func @transform_4(%arg0: i32) -> (i32, i32) {
    %c0_i32 = arith.constant 0 : i32
    %c0_i32_0 = arith.constant 0 : i32
    %c0_i32_1 = arith.constant 0 : i32
    return %c0_i32, %c0_i32_0 : i32, i32
  }
  func.func @transform_5(%arg0: i32) -> (i32, i32) {
    %c0_i32 = arith.constant 0 : i32
    %c0_i32_0 = arith.constant 0 : i32
    return %arg0, %c0_i32 : i32, i32
  }
}

</mosaic_0001>

<bundles_post_ra>
// kernel: simpler_nn_forward.1
= control target key start
LH: loop header
LB: loop body
LE: loop exit
PB: predicated region body
PF: predicated region fallthrough
CT: control target
= control target key end

     0   :  { %10 = vsyncpa [#allocation3], 0  ;;  %s3161_s0 = inlined_call_operand.vmem [shape: f32[8,768], index: 0, kind: input, shape index: {}]   ;;  %s3162_s1 = inlined_call_operand.hbm [shape: bf16[768,512], index: 1, kind: input, shape index: {}]   ;;  %s3163_s2 = inlined_call_operand.vmem [shape: f32[1,512], index: 2, kind: input, shape index: {}]   ;;  %s3164_s3 = inlined_call_operand.hbm [shape: bf16[512,128], index: 3, kind: input, shape index: {}]   ;;  %s3165_s4 = inlined_call_operand.vmem [shape: f32[1,128], index: 4, kind: input, shape index: {}]   ;;  %s3166_s5 = inlined_call_operand.vmem [shape: f32[8,128], index: 5, kind: output, shape index: {}]  }
   0x1   :  { %s18_s20 = sshll.u32 %s3162_s1, 4  ;;  %s19_s20 = int_to_ptr.hbm [resolvable:$true] %s18_s20 }
   0x2   :  { %11 = vsyncpa [#allocation5], 0  ;;  %s3044_s21 = smov [#allocation2]   ;;  %s33_s25 = sshll.u32 %s3164_s3, 4  ;;  %s34_s25 = int_to_ptr.hbm [resolvable:$true] %s33_s25 }
   0x3   :  { %s20_s22 = sshll.u32 %s3044_s21, 4  ;;  %s3045_s26 = smov 256   ;;  %s21_s22 = int_to_ptr.vmem [resolvable:$true] %s20_s22 }
   0x4   :  { %s3046_s27 = smov 16   ;;  %s3047_s28 = smov [#allocation4]  }
   0x5   :  { %26 = dma.hbm_to_vmem [thread:$0]  %s19_s20, 24576, %s21_s22, [#allocation3], %s3045_s26, %s3045_s26, %s3046_s27  }
   0x6   :  { %s35_s29 = sshll.u32 %s3047_s28, 4  ;;  %s3048_s30 = smov 64   ;;  %s36_s29 = int_to_ptr.vmem [resolvable:$true] %s35_s29 }
   0x7   :  { %s3049_s6 = smov 4  }
   0x8   :  { %41 = dma.hbm_to_vmem [thread:$0]  %s34_s25, 4096, %s36_s29, [#allocation5], %s3048_s30, %s3048_s30, %s3049_s6  }
   0x9   :  { %3040 = dma.done.wait [#allocation3], 24576  }
   0xa   :  { %3041 = vsyncadd [#allocation3], 4294942720 }
   0xb   :  { %3042 = dma.done.wait [#allocation5], 4096  }
   0xc   :  { %3043 = vsyncadd [#allocation5], 4294963200  ;;  %v1979_v0 = vld [vmem:[#allocation2 + $0xe0] sm:$0xf]  ;;  %v2791_v1 = vld [vmem:[#allocation2 + $0xec] sm:$0xf0] }
   0xd   :  { %v2107_v2 = vld [vmem:[#allocation2 + $0x1e0] sm:$0xf]  ;;  %v1980_v3 = vor.u32 %v2791_v1, %v1979_v0  ;;  %v2823_v4 = vld [vmem:[#allocation2 + $0x1ec] sm:$0xf0] }
   0xe   :  { %v2235_v5 = vld [vmem:[#allocation2 + $0x2e0] sm:$0xf]  ;;  %v2855_v6 = vld [vmem:[#allocation2 + $0x2ec] sm:$0xf0]  ;;  %v2108_v7 = vor.u32 %v2823_v4, %v2107_v2 }
   0xf   :  { %v2236_v8 = vor.u32 %v2855_v6, %v2235_v5  ;;  %v2363_v9 = vld [vmem:[#allocation2 + $0x3e0] sm:$0xf]  ;;  %v2887_v10 = vld [vmem:[#allocation2 + $0x3ec] sm:$0xf0]  ;;  %1226 = vmatpush.bf16.msra.mxu0 %v1980_v3 }
  0x10   :  { %v1963_v11 = vld [vmem:[#allocation2 + $0xc0] sm:$0xf]  ;;  %v2364_v12 = vor.u32 %v2887_v10, %v2363_v9  ;;  %v2787_v13 = vld [vmem:[#allocation2 + $0xcc] sm:$0xf0]  ;;  %1239 = vmatpush.bf16.msra.mxu1 %v2108_v7 }
  0x11   :  { %v2091_v14 = vld [vmem:[#allocation2 + $0x1c0] sm:$0xf]  ;;  %v2819_v15 = vld [vmem:[#allocation2 + $0x1cc] sm:$0xf0]  ;;  %1252 = vmatpush.bf16.msra.mxu2 %v2236_v8  ;;  %v1964_v16 = vor.u32 %v2787_v13, %v1963_v11 }
  0x12   :  { %v2092_v17 = vor.u32 %v2819_v15, %v2091_v14  ;;  %v2219_v18 = vld [vmem:[#allocation2 + $0x2c0] sm:$0xf]  ;;  %v2851_v19 = vld [vmem:[#allocation2 + $0x2cc] sm:$0xf0]  ;;  %1265 = vmatpush.bf16.msra.mxu3 %v2364_v12 }
  0x13   :  { %v2347_v20 = vld [vmem:[#allocation2 + $0x3c0] sm:$0xf]  ;;  %v2220_v21 = vor.u32 %v2851_v19, %v2219_v18  ;;  %v2883_v22 = vld [vmem:[#allocation2 + $0x3cc] sm:$0xf0]  ;;  %1227 = vmatpush.bf16.msra.mxu0 %v1964_v16 }
  0x14   :  { %v1947_v23 = vld [vmem:[#allocation2 + $0xa0] sm:$0xf]  ;;  %v2783_v24 = vld [vmem:[#allocation2 + $0xac] sm:$0xf0]  ;;  %v2348_v25 = vor.u32 %v2883_v22, %v2347_v20  ;;  %1240 = vmatpush.bf16.msra.mxu1 %v2092_v17 }
  0x15   :  { %v2075_v26 = vld [vmem:[#allocation2 + $0x1a0] sm:$0xf]  ;;  %v2815_v27 = vld [vmem:[#allocation2 + $0x1ac] sm:$0xf0]  ;;  %v1948_v29 = vor.u32 %v2783_v24, %v1947_v23  ;;  %1253 = vmatpush.bf16.msra.mxu2 %v2220_v21 }
  0x16   :  { %v2203_v28 = vld [vmem:[#allocation2 + $0x2a0] sm:$0xf]  ;;  %v2847_v30 = vld [vmem:[#allocation2 + $0x2ac] sm:$0xf0]  ;;  %v2076_v33 = vor.u32 %v2815_v27, %v2075_v26  ;;  %1266 = vmatpush.bf16.msra.mxu3 %v2348_v25 }
  0x17   :  { %v2331_v31 = vld [vmem:[#allocation2 + $0x3a0] sm:$0xf]  ;;  %v2879_v32 = vld [vmem:[#allocation2 + $0x3ac] sm:$0xf0]  ;;  %v2204_v34 = vor.u32 %v2847_v30, %v2203_v28  ;;  %1228 = vmatpush.bf16.msra.mxu0 %v1948_v29 }
  0x18   :  { %v1931_v35 = vld [vmem:[#allocation2 + $0x80] sm:$0xf]  ;;  %v2779_v36 = vld [vmem:[#allocation2 + $0x8c] sm:$0xf0]  ;;  %v2332_v38 = vor.u32 %v2879_v32, %v2331_v31  ;;  %1241 = vmatpush.bf16.msra.mxu1 %v2076_v33  ;;  %v2789_v33 = vld [vmem:[#allocation2 + $0xe4] sm:$0xf] }
  0x19   :  { %v2059_v37 = vld [vmem:[#allocation2 + $0x180] sm:$0xf]  ;;  %v2811_v39 = vld [vmem:[#allocation2 + $0x18c] sm:$0xf0]  ;;  %v1932_v44 = vor.u32 %v2779_v36, %v1931_v35  ;;  %1254 = vmatpush.bf16.msra.mxu2 %v2204_v34  ;;  %v1981_v34 = vld [vmem:[#allocation2 + $0xf0] sm:$0xf0] }
  0x1a   :  { %v2187_v40 = vld [vmem:[#allocation2 + $0x280] sm:$0xf]  ;;  %v2843_v41 = vld [vmem:[#allocation2 + $0x28c] sm:$0xf0]  ;;  %v2060_v45 = vor.u32 %v2811_v39, %v2059_v37  ;;  %1267 = vmatpush.bf16.msra.mxu3 %v2332_v38  ;;  %v2821_v37 = vld [vmem:[#allocation2 + $0x1e4] sm:$0xf] }
  0x1b   :  { %v2315_v42 = vld [vmem:[#allocation2 + $0x380] sm:$0xf]  ;;  %v2875_v43 = vld [vmem:[#allocation2 + $0x38c] sm:$0xf0]  ;;  %v2188_v46 = vor.u32 %v2843_v41, %v2187_v40  ;;  %1229 = vmatpush.bf16.msra.mxu0 %v1932_v44  ;;  %v2109_v38 = vld [vmem:[#allocation2 + $0x1f0] sm:$0xf0] }
  0x1c   :  { %v1915_v47 = vld [vmem:[#allocation2 + $0x60] sm:$0xf]  ;;  %v2775_v48 = vld [vmem:[#allocation2 + $0x6c] sm:$0xf0]  ;;  %v2316_v50 = vor.u32 %v2875_v43, %v2315_v42  ;;  %1242 = vmatpush.bf16.msra.mxu1 %v2060_v45  ;;  %v1984_v42 = vor.u32 %v2789_v33, %v1981_v34 }
  0x1d   :  { %v2043_v49 = vld [vmem:[#allocation2 + $0x160] sm:$0xf]  ;;  %v2807_v51 = vld [vmem:[#allocation2 + $0x16c] sm:$0xf0]  ;;  %v1916_v56 = vor.u32 %v2775_v48, %v1915_v47  ;;  %1255 = vmatpush.bf16.msra.mxu2 %v2188_v46  ;;  %v2112_v46 = vor.u32 %v2821_v37, %v2109_v38  ;;  %v2785_v48 = vld [vmem:[#allocation2 + $0xc4] sm:$0xf] }
  0x1e   :  { %v2171_v52 = vld [vmem:[#allocation2 + $0x260] sm:$0xf]  ;;  %v2839_v53 = vld [vmem:[#allocation2 + $0x26c] sm:$0xf0]  ;;  %v2044_v57 = vor.u32 %v2807_v51, %v2043_v49  ;;  %1268 = vmatpush.bf16.msra.mxu3 %v2316_v50  ;;  %v1965_v49 = vld [vmem:[#allocation2 + $0xd0] sm:$0xf0] }
  0x1f   :  { %v2299_v54 = vld [vmem:[#allocation2 + $0x360] sm:$0xf]  ;;  %v2871_v55 = vld [vmem:[#allocation2 + $0x36c] sm:$0xf0]  ;;  %v2172_v58 = vor.u32 %v2839_v53, %v2171_v52  ;;  %1230 = vmatpush.bf16.msra.mxu0 %v1916_v56  ;;  %v2817_v50 = vld [vmem:[#allocation2 + $0x1c4] sm:$0xf] }
  0x20   :  { %v1899_v59 = vld [vmem:[#allocation2 + $0x40] sm:$0xf]  ;;  %v2771_v60 = vld [vmem:[#allocation2 + $0x4c] sm:$0xf0]  ;;  %v2300_v62 = vor.u32 %v2871_v55, %v2299_v54  ;;  %1243 = vmatpush.bf16.msra.mxu1 %v2044_v57  ;;  %v2093_v51 = vld [vmem:[#allocation2 + $0x1d0] sm:$0xf0]  ;;  %v1968_v55 = vor.u32 %v2785_v48, %v1965_v49 }
  0x21   :  { %v2027_v61 = vld [vmem:[#allocation2 + $0x140] sm:$0xf]  ;;  %v2803_v63 = vld [vmem:[#allocation2 + $0x14c] sm:$0xf0]  ;;  %v1900_v4 = vor.u32 %v2771_v60, %v1899_v59  ;;  %1256 = vmatpush.bf16.msra.mxu2 %v2172_v58  ;;  %v2096_v59 = vor.u32 %v2817_v50, %v2093_v51  ;;  %v2781_v60 = vld [vmem:[#allocation2 + $0xa4] sm:$0xf] }
  0x22   :  { %v2155_v0 = vld [vmem:[#allocation2 + $0x240] sm:$0xf]  ;;  %v2835_v1 = vld [vmem:[#allocation2 + $0x24c] sm:$0xf0]  ;;  %v2028_v5 = vor.u32 %v2803_v63, %v2027_v61  ;;  %1269 = vmatpush.bf16.msra.mxu3 %v2300_v62  ;;  %v1949_v61 = vld [vmem:[#allocation2 + $0xb0] sm:$0xf0] }
  0x23   :  { %v2283_v2 = vld [vmem:[#allocation2 + $0x340] sm:$0xf]  ;;  %v2867_v3 = vld [vmem:[#allocation2 + $0x34c] sm:$0xf0]  ;;  %v2156_v6 = vor.u32 %v2835_v1, %v2155_v0  ;;  %1231 = vmatpush.bf16.msra.mxu0 %v1900_v4  ;;  %v2813_v62 = vld [vmem:[#allocation2 + $0x1a4] sm:$0xf] }
  0x24   :  { %v1883_v7 = vld [vmem:[#allocation2 + $0x20] sm:$0xf]  ;;  %v2767_v8 = vld [vmem:[#allocation2 + $0x2c] sm:$0xf0]  ;;  %v2284_v10 = vor.u32 %v2867_v3, %v2283_v2  ;;  %1244 = vmatpush.bf16.msra.mxu1 %v2028_v5  ;;  %v2077_v63 = vld [vmem:[#allocation2 + $0x1b0] sm:$0xf0]  ;;  %v1952_v5 = vor.u32 %v2781_v60, %v1949_v61 }
  0x25   :  { %v2011_v9 = vld [vmem:[#allocation2 + $0x120] sm:$0xf]  ;;  %v2799_v11 = vld [vmem:[#allocation2 + $0x12c] sm:$0xf0]  ;;  %v1884_v16 = vor.u32 %v2767_v8, %v1883_v7  ;;  %1257 = vmatpush.bf16.msra.mxu2 %v2156_v6 }
  0x26   :  { %v2139_v12 = vld [vmem:[#allocation2 + $0x220] sm:$0xf]  ;;  %v2831_v13 = vld [vmem:[#allocation2 + $0x22c] sm:$0xf0]  ;;  %v2012_v19 = vor.u32 %v2799_v11, %v2011_v9  ;;  %1270 = vmatpush.bf16.msra.mxu3 %v2284_v10  ;;  %v55_v10 = vld [vmem:[%s3161_s0 + $0x18] sm:$0xff]  ;;  %v2080_v11 = vor.u32 %v2813_v62, %v2077_v63 }
  0x27   :  { %v2267_v14 = vld [vmem:[#allocation2 + $0x320] sm:$0xf]  ;;  %v2863_v15 = vld [vmem:[#allocation2 + $0x32c] sm:$0xf0]  ;;  %v2140_v20 = vor.u32 %v2831_v13, %v2139_v12  ;;  %1232 = vmatpush.bf16.msra.mxu0 %v1884_v16  ;;  %v2777_v13 = vld [vmem:[#allocation2 + $0x84] sm:$0xf] }
  0x28   :  { %v1867_v17 = vld [vmem:[#allocation2] sm:$0xf]  ;;  %v2763_v18 = vld [vmem:[#allocation2 + $0xc] sm:$0xf0]  ;;  %v2268_v24 = vor.u32 %v2863_v15, %v2267_v14  ;;  %1245 = vmatpush.bf16.msra.mxu1 %v2012_v19  ;;  %v1933_v14 = vld [vmem:[#allocation2 + $0x90] sm:$0xf0]  ;;  %v3099_v15 = vpack.c.bf16 %v55_v10, %v55_v10 }
  0x29   :  { %v1995_v21 = vld [vmem:[#allocation2 + $0x100] sm:$0xf]  ;;  %v2795_v22 = vld [vmem:[#allocation2 + $0x10c] sm:$0xf0]  ;;  %v1868_v31 = vor.u32 %v2763_v18, %v1867_v17  ;;  %1258 = vmatpush.bf16.msra.mxu2 %v2140_v20  ;;  %v2809_v16 = vld [vmem:[#allocation2 + $0x184] sm:$0xf] }
  0x2a   :  { %v2123_v23 = vld [vmem:[#allocation2 + $0x200] sm:$0xf]  ;;  %v2827_v25 = vld [vmem:[#allocation2 + $0x20c] sm:$0xf0]  ;;  %v1996_v35 = vor.u32 %v2795_v22, %v1995_v21  ;;  %1271 = vmatpush.bf16.msra.mxu3 %v2268_v24  ;;  %v2061_v17 = vld [vmem:[#allocation2 + $0x190] sm:$0xf0]  ;;  %v1936_v21 = vor.u32 %v2777_v13, %v1933_v14 }
  0x2b   :  { %v2251_v26 = vld [vmem:[#allocation2 + $0x300] sm:$0xf]  ;;  %v2859_v27 = vld [vmem:[#allocation2 + $0x30c] sm:$0xf0]  ;;  %v2124_v36 = vor.u32 %v2827_v25, %v2123_v23  ;;  %1233 = vmatpush.bf16.msra.mxu0 %v1868_v31  ;;  %v53_v19 = vld [vmem:[%s3161_s0 + $0x8] sm:$0xff] }
  0x2c   :  { %v2491_v28 = vld [vmem:[#allocation2 + $0x4e0] sm:$0xf]  ;;  %v2919_v29 = vld [vmem:[#allocation2 + $0x4ec] sm:$0xf0]  ;;  %v2252_v39 = vor.u32 %v2859_v27, %v2251_v26  ;;  %1246 = vmatpush.bf16.msra.mxu1 %v1996_v35  ;;  %v3107_v25 = vpack.c.bf16 %v53_v19, %v53_v19  ;;  %v2064_v26 = vor.u32 %v2809_v16, %v2061_v17  ;;  %v2045_v31 = vld [vmem:[#allocation2 + $0x170] sm:$0xf0] }
  0x2d   :  { %v2619_v30 = vld [vmem:[#allocation2 + $0x5e0] sm:$0xf]  ;;  %v2951_v32 = vld [vmem:[#allocation2 + $0x5ec] sm:$0xf0]  ;;  %v2492_v40 = vor.u32 %v2919_v29, %v2491_v28  ;;  %1259 = vmatpush.bf16.msra.mxu2 %v2124_v36  ;;  %v2773_v28 = vld [vmem:[#allocation2 + $0x64] sm:$0xf] }
  0x2e   :  { %v2620_v41 = vor.u32 %v2951_v32, %v2619_v30  ;;  %v2475_v43 = vld [vmem:[#allocation2 + $0x4c0] sm:$0xf]  ;;  %v2915_v44 = vld [vmem:[#allocation2 + $0x4cc] sm:$0xf0]  ;;  %1272 = vmatpush.bf16.msra.mxu3 %v2252_v39  ;;  %v1917_v29 = vld [vmem:[#allocation2 + $0x70] sm:$0xf0] }
  0x2f   :  { %v2603_v45 = vld [vmem:[#allocation2 + $0x5c0] sm:$0xf]  ;;  %v2947_v47 = vld [vmem:[#allocation2 + $0x5cc] sm:$0xf0]  ;;  %1278 = vmatpush.bf16.msrb.mxu0 %v2492_v40  ;;  %v2476_v52 = vor.u32 %v2915_v44, %v2475_v43  ;;  %v2805_v30 = vld [vmem:[#allocation2 + $0x164] sm:$0xf]  ;;  %1247 = vmatmul.bf16.vlgmr.msra.gmra.mxu1 %v3107_v25  ;;  %v1920_v34 = vor.u32 %v2773_v28, %v1917_v29 }
  0x30   :  { %v2459_v53 = vld [vmem:[#allocation2 + $0x4a0] sm:$0xf]  ;;  %1291 = vmatpush.bf16.msrb.mxu1 %v2620_v41  ;;  %v2604_v54 = vor.u32 %v2947_v47, %v2603_v45  ;;  %v2911_v56 = vld [vmem:[#allocation2 + $0x4ac] sm:$0xf0]  ;;  %v2048_v38 = vor.u32 %v2805_v30, %v2045_v31  ;;  %v2769_v40 = vld [vmem:[#allocation2 + $0x44] sm:$0xf] }
  0x31   :  { %1304 = vmatpush.bf16.msrb.mxu2 %v1984_v42  ;;  %v2587_v57 = vld [vmem:[#allocation2 + $0x5a0] sm:$0xf]  ;;  %v2943_v58 = vld [vmem:[#allocation2 + $0x5ac] sm:$0xf0]  ;;  %v2460_v0 = vor.u32 %v2911_v56, %v2459_v53  ;;  %1273 = vmatmul.bf16.vlgmr.msra.gmra.mxu3 %v3099_v15  ;;  %v1901_v41 = vld [vmem:[#allocation2 + $0x50] sm:$0xf0] }
  0x32   :  { %1317 = vmatpush.bf16.msrb.mxu3 %v2112_v46  ;;  %v2588_v1 = vor.u32 %v2943_v58, %v2587_v57  ;;  %v2443_v2 = vld [vmem:[#allocation2 + $0x480] sm:$0xf]  ;;  %v54_v3 = vld [vmem:[%s3161_s0 + $0x10] sm:$0xff]  ;;  %v2801_v42 = vld [vmem:[#allocation2 + $0x144] sm:$0xf]  ;;  %v1904_v46 = vor.u32 %v2769_v40, %v1901_v41 }
  0x33   :  { %1279 = vmatpush.bf16.msrb.mxu0 %v2476_v52  ;;  %v52_v4 = vld [vmem:[%s3161_s0] sm:$0xff]  ;;  %v2907_v6 = vld [vmem:[#allocation2 + $0x48c] sm:$0xf0]  ;;  %v3092_v8 = vpack.c.bf16 %v54_v3, %v54_v3  ;;  %v2029_v43 = vld [vmem:[#allocation2 + $0x150] sm:$0xf0] }
  0x34   :  { %1292 = vmatpush.bf16.msrb.mxu1 %v2604_v54  ;;  %v2571_v7 = vld [vmem:[#allocation2 + $0x580] sm:$0xf]  ;;  %v3094_v9 = vpack.c.bf16 %v52_v4, %v52_v4  ;;  %v2939_v12 = vld [vmem:[#allocation2 + $0x58c] sm:$0xf0]  ;;  %v2444_v18 = vor.u32 %v2907_v6, %v2443_v2  ;;  %v2032_v50 = vor.u32 %v2801_v42, %v2029_v43  ;;  %v2765_v52 = vld [vmem:[#allocation2 + $0x24] sm:$0xf] }
  0x35   :  { %1305 = vmatpush.bf16.msrb.mxu2 %v1968_v55  ;;  %v2572_v20 = vor.u32 %v2939_v12, %v2571_v7  ;;  %v2427_v22 = vld [vmem:[#allocation2 + $0x460] sm:$0xf]  ;;  %v2903_v23 = vld [vmem:[#allocation2 + $0x46c] sm:$0xf0]  ;;  %v1885_v53 = vld [vmem:[#allocation2 + $0x30] sm:$0xf0] }
  0x36   :  { %1318 = vmatpush.bf16.msrb.mxu3 %v2096_v59  ;;  %1260 = vmatmul.bf16.vlgmr.msra.gmra.mxu2 %v3092_v8  ;;  %v2555_v24 = vld [vmem:[#allocation2 + $0x560] sm:$0xf]  ;;  %v2935_v27 = vld [vmem:[#allocation2 + $0x56c] sm:$0xf0]  ;;  %v2428_v32 = vor.u32 %v2903_v23, %v2427_v22  ;;  %v2797_v54 = vld [vmem:[#allocation2 + $0x124] sm:$0xf]  ;;  %v1888_v60 = vor.u32 %v2765_v52, %v1885_v53 }
  0x37   :  { %1234 = vmatmul.bf16.vlgmr.msra.gmra.mxu0 %v3094_v9  ;;  %v2556_v33 = vor.u32 %v2935_v27, %v2555_v24  ;;  %v2411_v35 = vld [vmem:[#allocation2 + $0x440] sm:$0xf]  ;;  %v2899_v36 = vld [vmem:[#allocation2 + $0x44c] sm:$0xf0]  ;;  %v2013_v55 = vld [vmem:[#allocation2 + $0x130] sm:$0xf0] }
  0x38   :  { %1280 = vmatpush.bf16.msrb.mxu0 %v2460_v0  ;;  %1293 = vmatpush.bf16.msrb.mxu1 %v2588_v1  ;;  %v2539_v37 = vld [vmem:[#allocation2 + $0x540] sm:$0xf]  ;;  %v2931_v39 = vld [vmem:[#allocation2 + $0x54c] sm:$0xf0]  ;;  %v2412_v44 = vor.u32 %v2899_v36, %v2411_v35  ;;  %v2761_v63 = vld [vmem:[#allocation2 + $0x4] sm:$0xf]  ;;  %v2016_v0 = vor.u32 %v2797_v54, %v2013_v55 }
  0x39   :  { %1306 = vmatpush.bf16.msrb.mxu2 %v1952_v5  ;;  %v2540_v45 = vor.u32 %v2931_v39, %v2539_v37  ;;  %v2395_v47 = vld [vmem:[#allocation2 + $0x420] sm:$0xf]  ;;  %v2895_v48 = vld [vmem:[#allocation2 + $0x42c] sm:$0xf0]  ;;  %v1869_v1 = vld [vmem:[#allocation2 + $0x10] sm:$0xf0] }
  0x3a   :  { %1319 = vmatpush.bf16.msrb.mxu3 %v2080_v11  ;;  %v2523_v49 = vld [vmem:[#allocation2 + $0x520] sm:$0xf]  ;;  %v2927_v51 = vld [vmem:[#allocation2 + $0x52c] sm:$0xf0]  ;;  %v2396_v56 = vor.u32 %v2895_v48, %v2395_v47  ;;  %v2793_v2 = vld [vmem:[#allocation2 + $0x104] sm:$0xf]  ;;  %v1872_v14 = vor.u32 %v2761_v63, %v1869_v1 }
  0x3b   :  { %v2379_v57 = vld [vmem:[#allocation2 + $0x400] sm:$0xf]  ;;  %v2891_v58 = vld [vmem:[#allocation2 + $0x40c] sm:$0xf0]  ;;  %v2524_v59 = vor.u32 %v2927_v51, %v2523_v49  ;;  %v1997_v3 = vld [vmem:[#allocation2 + $0x110] sm:$0xf0] }
  0x3c   :  { %1281 = vmatpush.bf16.msrb.mxu0 %v2444_v18  ;;  %1294 = vmatpush.bf16.msrb.mxu1 %v2572_v20  ;;  %v2507_v61 = vld [vmem:[#allocation2 + $0x500] sm:$0xf]  ;;  %v2923_v62 = vld [vmem:[#allocation2 + $0x50c] sm:$0xf0]  ;;  %v2853_v4 = vld [vmem:[#allocation2 + $0x2e4] sm:$0xf]  ;;  %v2380_v7 = vor.u32 %v2891_v58, %v2379_v57  ;;  %v2000_v19 = vor.u32 %v2793_v2, %v1997_v3 }
  0x3d   :  { %1307 = vmatpush.bf16.msrb.mxu2 %v1936_v21  ;;  %v2237_v5 = vld [vmem:[#allocation2 + $0x2f0] sm:$0xf0]  ;;  %v2885_v6 = vld [vmem:[#allocation2 + $0x3e4] sm:$0xf]  ;;  %v2508_v13 = vor.u32 %v2923_v62, %v2507_v61  ;;  %v57_v21 = vld [vmem:[%s3161_s0 + $0x28] sm:$0xff] }
  0x3e   :  { %1320 = vmatpush.bf16.msrb.mxu3 %v2064_v26  ;;  %v2365_v10 = vld [vmem:[#allocation2 + $0x3f0] sm:$0xf0]  ;;  %v2917_v11 = vld [vmem:[#allocation2 + $0x4e4] sm:$0xf]  ;;  %v2240_v20 = vor.u32 %v2853_v4, %v2237_v5  ;;  %v3118_v35 = vpack.c.bf16 %v57_v21, %v57_v21 }
  0x3f   :  { %v2493_v12 = vld [vmem:[#allocation2 + $0x4f0] sm:$0xf0]  ;;  %v2949_v16 = vld [vmem:[#allocation2 + $0x5e4] sm:$0xf]  ;;  %v2368_v22 = vor.u32 %v2885_v6, %v2365_v10 }
  0x40   :  { %1282 = vmatpush.bf16.msrb.mxu0 %v2428_v32  ;;  %1295 = vmatpush.bf16.msrb.mxu1 %v2556_v33  ;;  %v2621_v17 = vld [vmem:[#allocation2 + $0x5f0] sm:$0xf0]  ;;  %v56_v18 = vld [vmem:[%s3161_s0 + $0x20] sm:$0xff]  ;;  %v2496_v23 = vor.u32 %v2917_v11, %v2493_v12 }
  0x41   :  { %1308 = vmatpush.bf16.msrb.mxu2 %v1920_v34  ;;  %v2849_v24 = vld [vmem:[#allocation2 + $0x2c4] sm:$0xf]  ;;  %v2221_v26 = vld [vmem:[#allocation2 + $0x2d0] sm:$0xf0]  ;;  %v2624_v28 = vor.u32 %v2949_v16, %v2621_v17  ;;  %v3116_v32 = vpack.c.bf16 %v56_v18, %v56_v18 }
  0x42   :  { %1321 = vmatpush.bf16.msrb.mxu3 %v2048_v38  ;;  %v2881_v27 = vld [vmem:[#allocation2 + $0x3c4] sm:$0xf]  ;;  %v2349_v29 = vld [vmem:[#allocation2 + $0x3d0] sm:$0xf0]  ;;  %v2224_v36 = vor.u32 %v2849_v24, %v2221_v26 }
  0x43   :  { %v2913_v30 = vld [vmem:[#allocation2 + $0x4c4] sm:$0xf]  ;;  %v2477_v31 = vld [vmem:[#allocation2 + $0x4d0] sm:$0xf0]  ;;  %v2352_v37 = vor.u32 %v2881_v27, %v2349_v29 }
  0x44   :  { %1283 = vmatpush.bf16.msrb.mxu0 %v2412_v44  ;;  %1296 = vmatpush.bf16.msrb.mxu1 %v2540_v45  ;;  %v2945_v33 = vld [vmem:[#allocation2 + $0x5c4] sm:$0xf]  ;;  %v2605_v34 = vld [vmem:[#allocation2 + $0x5d0] sm:$0xf0]  ;;  %v2480_v38 = vor.u32 %v2913_v30, %v2477_v31 }
  0x45   :  { %1309 = vmatpush.bf16.msrb.mxu2 %v1904_v46  ;;  %v2845_v39 = vld [vmem:[#allocation2 + $0x2a4] sm:$0xf]  ;;  %v2205_v40 = vld [vmem:[#allocation2 + $0x2b0] sm:$0xf0]  ;;  %v2608_v42 = vor.u32 %v2945_v33, %v2605_v34 }
  0x46   :  { %1322 = vmatpush.bf16.msrb.mxu3 %v2032_v50  ;;  %v2877_v41 = vld [vmem:[#allocation2 + $0x3a4] sm:$0xf]  ;;  %v2333_v43 = vld [vmem:[#allocation2 + $0x3b0] sm:$0xf0]  ;;  %v2208_v48 = vor.u32 %v2845_v39, %v2205_v40 }
  0x47   :  { %v2909_v44 = vld [vmem:[#allocation2 + $0x4a4] sm:$0xf]  ;;  %v2461_v45 = vld [vmem:[#allocation2 + $0x4b0] sm:$0xf0]  ;;  %v2336_v49 = vor.u32 %v2877_v41, %v2333_v43 }
  0x48   :  { %1284 = vmatpush.bf16.msrb.mxu0 %v2396_v56  ;;  %1297 = vmatpush.bf16.msrb.mxu1 %v2524_v59  ;;  %v2941_v46 = vld [vmem:[#allocation2 + $0x5a4] sm:$0xf]  ;;  %v2589_v47 = vld [vmem:[#allocation2 + $0x5b0] sm:$0xf0]  ;;  %v2464_v50 = vor.u32 %v2909_v44, %v2461_v45 }
  0x49   :  { %1310 = vmatpush.bf16.msrb.mxu2 %v1888_v60  ;;  %v2841_v51 = vld [vmem:[#allocation2 + $0x284] sm:$0xf]  ;;  %v2189_v52 = vld [vmem:[#allocation2 + $0x290] sm:$0xf0]  ;;  %v2592_v54 = vor.u32 %v2941_v46, %v2589_v47 }
  0x4a   :  { %1323 = vmatpush.bf16.msrb.mxu3 %v2016_v0  ;;  %v2873_v53 = vld [vmem:[#allocation2 + $0x384] sm:$0xf]  ;;  %v2317_v55 = vld [vmem:[#allocation2 + $0x390] sm:$0xf0]  ;;  %v2192_v60 = vor.u32 %v2841_v51, %v2189_v52  ;;  %v2792_v51 = vld [vmem:[#allocation2 + $0xf4] sm:$0xf0] }
  0x4b   :  { %v2905_v56 = vld [vmem:[#allocation2 + $0x484] sm:$0xf]  ;;  %v2445_v57 = vld [vmem:[#allocation2 + $0x490] sm:$0xf0]  ;;  %v2320_v61 = vor.u32 %v2873_v53, %v2317_v55  ;;  %v2115_v52 = vld [vmem:[#allocation2 + $0x1e8] sm:$0xf] }
  0x4c   :  { %1285 = vmatpush.bf16.msrb.mxu0 %v2380_v7  ;;  %1298 = vmatpush.bf16.msrb.mxu1 %v2508_v13  ;;  %v2937_v58 = vld [vmem:[#allocation2 + $0x584] sm:$0xf]  ;;  %v2573_v59 = vld [vmem:[#allocation2 + $0x590] sm:$0xf0]  ;;  %v2448_v62 = vor.u32 %v2905_v56, %v2445_v57  ;;  %v2243_v55 = vld [vmem:[#allocation2 + $0x2e8] sm:$0xf] }
  0x4d   :  { %1311 = vmatpush.bf16.msrb.mxu2 %v1872_v14  ;;  %v2837_v63 = vld [vmem:[#allocation2 + $0x264] sm:$0xf]  ;;  %v2173_v0 = vld [vmem:[#allocation2 + $0x270] sm:$0xf0]  ;;  %v2576_v2 = vor.u32 %v2937_v58, %v2573_v59  ;;  %v2856_v56 = vld [vmem:[#allocation2 + $0x2f4] sm:$0xf0] }
  0x4e   :  { %1324 = vmatpush.bf16.msrb.mxu3 %v2000_v19  ;;  %v2869_v1 = vld [vmem:[#allocation2 + $0x364] sm:$0xf]  ;;  %v2301_v3 = vld [vmem:[#allocation2 + $0x370] sm:$0xf0]  ;;  %v2176_v10 = vor.u32 %v2837_v63, %v2173_v0  ;;  %v2371_v59 = vld [vmem:[#allocation2 + $0x3e8] sm:$0xf]  ;;  %v2244_v0 = vor.u32 %v2856_v56, %v2243_v55 }
  0x4f   :  { %1286 = vmatmul.bf16.vlgmr.msrb.gmra.mxu0 %v3116_v32  ;;  %1299 = vmatmul.bf16.vlgmr.msrb.gmra.mxu1 %v3118_v35  ;;  %v2901_v4 = vld [vmem:[#allocation2 + $0x464] sm:$0xf]  ;;  %v2429_v5 = vld [vmem:[#allocation2 + $0x470] sm:$0xf0]  ;;  %v2304_v11 = vor.u32 %v2869_v1, %v2301_v3  ;;  %v1971_v1 = vld [vmem:[#allocation2 + $0xc8] sm:$0xf] }
  0x50   :  { %1330 = vmatpush.bf16.msra.mxu0 %v2240_v20  ;;  %1343 = vmatpush.bf16.msra.mxu1 %v2368_v22  ;;  %v2933_v6 = vld [vmem:[#allocation2 + $0x564] sm:$0xf]  ;;  %v2557_v7 = vld [vmem:[#allocation2 + $0x570] sm:$0xf0]  ;;  %v2432_v12 = vor.u32 %v2901_v4, %v2429_v5  ;;  %v2099_v3 = vld [vmem:[#allocation2 + $0x1c8] sm:$0xf] }
  0x51   :  { %1356 = vmatpush.bf16.msra.mxu2 %v2496_v23  ;;  %1325 = vmatmul.bf16.vlgmr.msrb.gmra.mxu3 %v3107_v25  ;;  %v2833_v13 = vld [vmem:[#allocation2 + $0x244] sm:$0xf]  ;;  %v2157_v14 = vld [vmem:[#allocation2 + $0x250] sm:$0xf0]  ;;  %v2560_v17 = vor.u32 %v2933_v6, %v2557_v7  ;;  %v2820_v5 = vld [vmem:[#allocation2 + $0x1d4] sm:$0xf0] }
  0x52   :  { %1369 = vmatpush.bf16.msra.mxu3 %v2624_v28  ;;  %1312 = vmatmul.bf16.vlgmr.msrb.gmra.mxu2 %v3094_v9  ;;  %v2865_v16 = vld [vmem:[#allocation2 + $0x344] sm:$0xf]  ;;  %v2285_v18 = vld [vmem:[#allocation2 + $0x350] sm:$0xf0]  ;;  %v2160_v23 = vor.u32 %v2833_v13, %v2157_v14  ;;  %v2227_v6 = vld [vmem:[#allocation2 + $0x2c8] sm:$0xf]  ;;  %v2100_v13 = vor.u32 %v2820_v5, %v2099_v3 }
  0x53   :  { %v2897_v19 = vld [vmem:[#allocation2 + $0x444] sm:$0xf]  ;;  %v2413_v20 = vld [vmem:[#allocation2 + $0x450] sm:$0xf0]  ;;  %v2288_v24 = vor.u32 %v2865_v16, %v2285_v18  ;;  %v2852_v7 = vld [vmem:[#allocation2 + $0x2d4] sm:$0xf0] }
  0x54   :  { %1331 = vmatpush.bf16.msra.mxu0 %v2224_v36  ;;  %1344 = vmatpush.bf16.msra.mxu1 %v2352_v37  ;;  %v2929_v21 = vld [vmem:[#allocation2 + $0x544] sm:$0xf]  ;;  %v2541_v22 = vld [vmem:[#allocation2 + $0x550] sm:$0xf0]  ;;  %v2416_v26 = vor.u32 %v2897_v19, %v2413_v20  ;;  %v2228_v14 = vor.u32 %v2852_v7, %v2227_v6  ;;  %v1955_v16 = vld [vmem:[#allocation2 + $0xa8] sm:$0xf] }
  0x55   :  { %1357 = vmatpush.bf16.msra.mxu2 %v2480_v38  ;;  %v2829_v27 = vld [vmem:[#allocation2 + $0x224] sm:$0xf]  ;;  %v2141_v28 = vld [vmem:[#allocation2 + $0x230] sm:$0xf0]  ;;  %v2544_v30 = vor.u32 %v2929_v21, %v2541_v22  ;;  %v2083_v18 = vld [vmem:[#allocation2 + $0x1a8] sm:$0xf] }
  0x56   :  { %1370 = vmatpush.bf16.msra.mxu3 %v2608_v42  ;;  %v2861_v29 = vld [vmem:[#allocation2 + $0x324] sm:$0xf]  ;;  %v2269_v31 = vld [vmem:[#allocation2 + $0x330] sm:$0xf0]  ;;  %v2144_v38 = vor.u32 %v2829_v27, %v2141_v28  ;;  %v2816_v20 = vld [vmem:[#allocation2 + $0x1b4] sm:$0xf0] }
  0x57   :  { %v2893_v33 = vld [vmem:[#allocation2 + $0x424] sm:$0xf]  ;;  %v2397_v34 = vld [vmem:[#allocation2 + $0x430] sm:$0xf0]  ;;  %v2272_v41 = vor.u32 %v2861_v29, %v2269_v31  ;;  %v2211_v21 = vld [vmem:[#allocation2 + $0x2a8] sm:$0xf]  ;;  %v2084_v27 = vor.u32 %v2816_v20, %v2083_v18 }
  0x58   :  { %1332 = vmatpush.bf16.msra.mxu0 %v2208_v48  ;;  %1345 = vmatpush.bf16.msra.mxu1 %v2336_v49  ;;  %v2925_v36 = vld [vmem:[#allocation2 + $0x524] sm:$0xf]  ;;  %v2525_v37 = vld [vmem:[#allocation2 + $0x530] sm:$0xf0]  ;;  %v2400_v42 = vor.u32 %v2893_v33, %v2397_v34  ;;  %v2848_v22 = vld [vmem:[#allocation2 + $0x2b4] sm:$0xf0] }
  0x59   :  { %1358 = vmatpush.bf16.msra.mxu2 %v2464_v50  ;;  %v2825_v39 = vld [vmem:[#allocation2 + $0x204] sm:$0xf]  ;;  %v2125_v40 = vld [vmem:[#allocation2 + $0x210] sm:$0xf0]  ;;  %v2528_v46 = vor.u32 %v2925_v36, %v2525_v37  ;;  %v1987_v50 = vld [vmem:[#allocation2 + $0xe8] sm:$0xf]  ;;  %v2212_v28 = vor.u32 %v2848_v22, %v2211_v21 }
  0x5a   :  { %1371 = vmatpush.bf16.msra.mxu3 %v2592_v54  ;;  %v2857_v43 = vld [vmem:[#allocation2 + $0x304] sm:$0xf]  ;;  %v2253_v44 = vld [vmem:[#allocation2 + $0x310] sm:$0xf0]  ;;  %v2128_v53 = vor.u32 %v2825_v39, %v2125_v40  ;;  %v2824_v54 = vld [vmem:[#allocation2 + $0x1f4] sm:$0xf0] }
  0x5b   :  { %v2889_v45 = vld [vmem:[#allocation2 + $0x404] sm:$0xf]  ;;  %v2381_v47 = vld [vmem:[#allocation2 + $0x410] sm:$0xf0]  ;;  %v2256_v57 = vor.u32 %v2857_v43, %v2253_v44  ;;  %v2116_v63 = vor.u32 %v2824_v54, %v2115_v52  ;;  %v1939_v29 = vld [vmem:[#allocation2 + $0x88] sm:$0xf] }
  0x5c   :  { %1333 = vmatpush.bf16.msra.mxu0 %v2192_v60  ;;  %1346 = vmatpush.bf16.msra.mxu1 %v2320_v61  ;;  %v2921_v48 = vld [vmem:[#allocation2 + $0x504] sm:$0xf]  ;;  %v2509_v49 = vld [vmem:[#allocation2 + $0x510] sm:$0xf0]  ;;  %v2384_v58 = vor.u32 %v2889_v45, %v2381_v47  ;;  %v2888_v60 = vld [vmem:[#allocation2 + $0x3f4] sm:$0xf0] }
  0x5d   :  { %1359 = vmatpush.bf16.msra.mxu2 %v2448_v62  ;;  %v2512_v61 = vor.u32 %v2921_v48, %v2509_v49  ;;  %v1988_v62 = vor.u32 %v2792_v51, %v1987_v50  ;;  %v2372_v4 = vor.u32 %v2888_v60, %v2371_v59  ;;  %v2067_v31 = vld [vmem:[#allocation2 + $0x188] sm:$0xf]  ;;  %v2812_v34 = vld [vmem:[#allocation2 + $0x194] sm:$0xf0] }
  0x5e   :  { %1372 = vmatpush.bf16.msra.mxu3 %v2576_v2  ;;  %v2788_v2 = vld [vmem:[#allocation2 + $0xd4] sm:$0xf0]  ;;  %v2195_v36 = vld [vmem:[#allocation2 + $0x288] sm:$0xf] }
  0x5f   :  { %v2844_v37 = vld [vmem:[#allocation2 + $0x294] sm:$0xf0]  ;;  %v1923_v43 = vld [vmem:[#allocation2 + $0x68] sm:$0xf] }
  0x60   :  { %1334 = vmatpush.bf16.msra.mxu0 %v2176_v10  ;;  %1347 = vmatpush.bf16.msra.mxu1 %v2304_v11  ;;  %v2355_v10 = vld [vmem:[#allocation2 + $0x3c8] sm:$0xf]  ;;  %v2884_v11 = vld [vmem:[#allocation2 + $0x3d4] sm:$0xf0] }
  0x61   :  { %1360 = vmatpush.bf16.msra.mxu2 %v2432_v12  ;;  %v1972_v12 = vor.u32 %v2788_v2, %v1971_v1  ;;  %v2356_v19 = vor.u32 %v2884_v11, %v2355_v10  ;;  %v2876_v39 = vld [vmem:[#allocation2 + $0x394] sm:$0xf0]  ;;  %v2051_v45 = vld [vmem:[#allocation2 + $0x168] sm:$0xf] }
  0x62   :  { %1373 = vmatpush.bf16.msra.mxu3 %v2560_v17  ;;  %v2784_v17 = vld [vmem:[#allocation2 + $0xb4] sm:$0xf0]  ;;  %v2179_v48 = vld [vmem:[#allocation2 + $0x268] sm:$0xf] }
  0x63   :  { %v2776_v44 = vld [vmem:[#allocation2 + $0x74] sm:$0xf0]  ;;  %v2307_v50 = vld [vmem:[#allocation2 + $0x368] sm:$0xf] }
  0x64   :  { %1335 = vmatpush.bf16.msra.mxu0 %v2160_v23  ;;  %1348 = vmatpush.bf16.msra.mxu1 %v2288_v24  ;;  %v2339_v23 = vld [vmem:[#allocation2 + $0x3a8] sm:$0xf]  ;;  %v2880_v24 = vld [vmem:[#allocation2 + $0x3b4] sm:$0xf0]  ;;  %v1924_v52 = vor.u32 %v2776_v44, %v1923_v43 }
  0x65   :  { %1361 = vmatpush.bf16.msra.mxu2 %v2416_v26  ;;  %v1956_v26 = vor.u32 %v2784_v17, %v1955_v16  ;;  %v2340_v33 = vor.u32 %v2880_v24, %v2339_v23  ;;  %v2808_v47 = vld [vmem:[#allocation2 + $0x174] sm:$0xf0]  ;;  %v1907_v55 = vld [vmem:[#allocation2 + $0x48] sm:$0xf] }
  0x66   :  { %1374 = vmatpush.bf16.msra.mxu3 %v2544_v30  ;;  %v2780_v30 = vld [vmem:[#allocation2 + $0x94] sm:$0xf0]  ;;  %v2163_v60 = vld [vmem:[#allocation2 + $0x248] sm:$0xf] }
  0x67   :  { %v1940_v40 = vor.u32 %v2780_v30, %v1939_v29  ;;  %v2840_v49 = vld [vmem:[#allocation2 + $0x274] sm:$0xf0]  ;;  %v1891_v3 = vld [vmem:[#allocation2 + $0x28] sm:$0xf] }
  0x68   :  { %1336 = vmatpush.bf16.msra.mxu0 %v2144_v38  ;;  %1349 = vmatpush.bf16.msra.mxu1 %v2272_v41  ;;  %v2323_v38 = vld [vmem:[#allocation2 + $0x388] sm:$0xf]  ;;  %v2068_v41 = vor.u32 %v2812_v34, %v2067_v31  ;;  %v2872_v51 = vld [vmem:[#allocation2 + $0x374] sm:$0xf0]  ;;  %v2180_v54 = vor.u32 %v2840_v49, %v2179_v48  ;;  %v2790_v34 = vld [vmem:[#allocation2 + $0xec] sm:$0xf] }
  0x69   :  { %1362 = vmatpush.bf16.msra.mxu2 %v2400_v42  ;;  %v2196_v42 = vor.u32 %v2844_v37, %v2195_v36  ;;  %v2772_v56 = vld [vmem:[#allocation2 + $0x54] sm:$0xf0]  ;;  %v2019_v5 = vld [vmem:[#allocation2 + $0x128] sm:$0xf]  ;;  %v1989_v36 = vld [vmem:[#allocation2 + $0xf8] sm:$0xf0] }
  0x6a   :  { %1375 = vmatpush.bf16.msra.mxu3 %v2528_v46  ;;  %v2324_v46 = vor.u32 %v2876_v39, %v2323_v38  ;;  %v2804_v59 = vld [vmem:[#allocation2 + $0x154] sm:$0xf0]  ;;  %v2147_v10 = vld [vmem:[#allocation2 + $0x228] sm:$0xf]  ;;  %v2822_v39 = vld [vmem:[#allocation2 + $0x1ec] sm:$0xf]  ;;  %v1992_v44 = vor.u32 %v2790_v34, %v1989_v36 }
  0x6b   :  { %v2800_v7 = vld [vmem:[#allocation2 + $0x134] sm:$0xf0]  ;;  %v1875_v16 = vld [vmem:[#allocation2 + $0x8] sm:$0xf] }
  0x6c   :  { %1337 = vmatpush.bf16.msra.mxu0 %v2128_v53  ;;  %1350 = vmatpush.bf16.msra.mxu1 %v2256_v57  ;;  %v2052_v53 = vor.u32 %v2808_v47, %v2051_v45  ;;  %v2035_v57 = vld [vmem:[#allocation2 + $0x148] sm:$0xf]  ;;  %v2832_v11 = vld [vmem:[#allocation2 + $0x234] sm:$0xf0]  ;;  %v2020_v18 = vor.u32 %v2800_v7, %v2019_v5 }
  0x6d   :  { %1363 = vmatpush.bf16.msra.mxu2 %v2384_v58  ;;  %v2308_v58 = vor.u32 %v2872_v51, %v2307_v50  ;;  %v2036_v1 = vor.u32 %v2804_v59, %v2035_v57  ;;  %v2764_v17 = vld [vmem:[#allocation2 + $0x14] sm:$0xf0]  ;;  %v2003_v20 = vld [vmem:[#allocation2 + $0x108] sm:$0xf]  ;;  %v2786_v50 = vld [vmem:[#allocation2 + $0xcc] sm:$0xf] }
  0x6e   :  { %1376 = vmatpush.bf16.msra.mxu3 %v2512_v61  ;;  %v2836_v61 = vld [vmem:[#allocation2 + $0x254] sm:$0xf0]  ;;  %v2131_v22 = vld [vmem:[#allocation2 + $0x208] sm:$0xf]  ;;  %v1876_v31 = vor.u32 %v2764_v17, %v1875_v16  ;;  %v1973_v51 = vld [vmem:[#allocation2 + $0xd8] sm:$0xf0] }
  0x6f   :  { %1338 = vmatmul.bf16.vlgmr.msra.gmra.mxu0 %v3092_v8  ;;  %1351 = vmatmul.bf16.vlgmr.msra.gmra.mxu1 %v3099_v15  ;;  %v2164_v2 = vor.u32 %v2836_v61, %v2163_v60  ;;  %v2796_v21 = vld [vmem:[#allocation2 + $0x114] sm:$0xf0]  ;;  %v2627_v30 = vld [vmem:[#allocation2 + $0x5e8] sm:$0xf]  ;;  %v2069_v16 = vld [vmem:[#allocation2 + $0x198] sm:$0xf0] }
  0x70   :  { %1382 = vmatpush.bf16.msrb.mxu0 %v1988_v62  ;;  %1395 = vmatpush.bf16.msrb.mxu1 %v2116_v63  ;;  %v2291_v62 = vld [vmem:[#allocation2 + $0x348] sm:$0xf]  ;;  %v2868_v63 = vld [vmem:[#allocation2 + $0x354] sm:$0xf0]  ;;  %v2004_v37 = vor.u32 %v2796_v21, %v2003_v20 }
  0x71   :  { %1408 = vmatpush.bf16.msrb.mxu2 %v2244_v0  ;;  %1377 = vmatmul.bf16.vlgmr.msra.gmra.mxu3 %v3118_v35  ;;  %v1908_v0 = vor.u32 %v2772_v56, %v1907_v55  ;;  %v2292_v6 = vor.u32 %v2868_v63, %v2291_v62  ;;  %v2828_v24 = vld [vmem:[#allocation2 + $0x214] sm:$0xf0]  ;;  %v2483_v45 = vld [vmem:[#allocation2 + $0x4c8] sm:$0xf]  ;;  %v1976_v56 = vor.u32 %v2786_v50, %v1973_v51  ;;  %v2782_v62 = vld [vmem:[#allocation2 + $0xac] sm:$0xf] }
  0x72   :  { %1421 = vmatpush.bf16.msrb.mxu3 %v2372_v4  ;;  %1364 = vmatmul.bf16.vlgmr.msra.gmra.mxu2 %v3116_v32  ;;  %v2768_v4 = vld [vmem:[#allocation2 + $0x34] sm:$0xf0]  ;;  %v2132_v38 = vor.u32 %v2828_v24, %v2131_v22  ;;  %v2611_v47 = vld [vmem:[#allocation2 + $0x5c8] sm:$0xf]  ;;  %v1957_v63 = vld [vmem:[#allocation2 + $0xb8] sm:$0xf0] }
  0x73   :  { %v2920_v29 = vld [vmem:[#allocation2 + $0x4f4] sm:$0xf0]  ;;  %v2467_v57 = vld [vmem:[#allocation2 + $0x4a8] sm:$0xf] }
  0x74   :  { %1383 = vmatpush.bf16.msrb.mxu0 %v1972_v12  ;;  %1396 = vmatpush.bf16.msrb.mxu1 %v2100_v13  ;;  %v2275_v12 = vld [vmem:[#allocation2 + $0x328] sm:$0xf]  ;;  %v2864_v13 = vld [vmem:[#allocation2 + $0x334] sm:$0xf0] }
  0x75   :  { %1409 = vmatpush.bf16.msrb.mxu2 %v2228_v14  ;;  %v1892_v14 = vor.u32 %v2768_v4, %v1891_v3  ;;  %v2276_v23 = vor.u32 %v2864_v13, %v2275_v12  ;;  %v2948_v49 = vld [vmem:[#allocation2 + $0x5d4] sm:$0xf0]  ;;  %v2595_v59 = vld [vmem:[#allocation2 + $0x5a8] sm:$0xf]  ;;  %v1960_v4 = vor.u32 %v2782_v62, %v1957_v63  ;;  %v2778_v12 = vld [vmem:[#allocation2 + $0x8c] sm:$0xf] }
  0x76   :  { %1422 = vmatpush.bf16.msrb.mxu3 %v2356_v19  ;;  %v2148_v19 = vor.u32 %v2832_v11, %v2147_v10  ;;  %v2612_v55 = vor.u32 %v2948_v49, %v2611_v47  ;;  %v2944_v61 = vld [vmem:[#allocation2 + $0x5b4] sm:$0xf0]  ;;  %v2451_v5 = vld [vmem:[#allocation2 + $0x488] sm:$0xf]  ;;  %v1941_v13 = vld [vmem:[#allocation2 + $0x98] sm:$0xf0] }
  0x77   :  { %v2596_v3 = vor.u32 %v2944_v61, %v2595_v59  ;;  %v2579_v7 = vld [vmem:[#allocation2 + $0x588] sm:$0xf]  ;;  %v2940_v11 = vld [vmem:[#allocation2 + $0x594] sm:$0xf0]  ;;  %v2762_v63 = vld [vmem:[#allocation2 + $0xc] sm:$0xf] }
  0x78   :  { %1384 = vmatpush.bf16.msrb.mxu0 %v1956_v26  ;;  %1397 = vmatpush.bf16.msrb.mxu1 %v2084_v27  ;;  %v2259_v26 = vld [vmem:[#allocation2 + $0x308] sm:$0xf]  ;;  %v2860_v27 = vld [vmem:[#allocation2 + $0x314] sm:$0xf0] }
  0x79   :  { %1410 = vmatpush.bf16.msrb.mxu2 %v2212_v28  ;;  %v2499_v28 = vld [vmem:[#allocation2 + $0x4e8] sm:$0xf]  ;;  %v2904_v21 = vld [vmem:[#allocation2 + $0x474] sm:$0xf0] }
  0x7a   :  { %1423 = vmatpush.bf16.msrb.mxu3 %v2340_v33  ;;  %v2952_v33 = vld [vmem:[#allocation2 + $0x5f4] sm:$0xf0]  ;;  %v2435_v20 = vld [vmem:[#allocation2 + $0x468] sm:$0xf] }
  0x7b   :  { %v2628_v43 = vor.u32 %v2952_v33, %v2627_v30  ;;  %v2563_v22 = vld [vmem:[#allocation2 + $0x568] sm:$0xf]  ;;  %v2936_v24 = vld [vmem:[#allocation2 + $0x574] sm:$0xf0]  ;;  %v2436_v30 = vor.u32 %v2904_v21, %v2435_v20 }
  0x7c   :  { %1385 = vmatpush.bf16.msrb.mxu0 %v1940_v40  ;;  %1398 = vmatpush.bf16.msrb.mxu1 %v2068_v41  ;;  %v2117_v40 = vld [vmem:[#allocation2 + $0x1f8] sm:$0xf0]  ;;  %v2260_v41 = vor.u32 %v2860_v27, %v2259_v26  ;;  %v2774_v26 = vld [vmem:[#allocation2 + $0x6c] sm:$0xf]  ;;  %v2419_v34 = vld [vmem:[#allocation2 + $0x448] sm:$0xf] }
  0x7d   :  { %1411 = vmatpush.bf16.msrb.mxu2 %v2196_v42  ;;  %v2500_v42 = vor.u32 %v2920_v29, %v2499_v28  ;;  %v2120_v48 = vor.u32 %v2822_v39, %v2117_v40  ;;  %v1925_v27 = vld [vmem:[#allocation2 + $0x78] sm:$0xf0]  ;;  %v2806_v28 = vld [vmem:[#allocation2 + $0x16c] sm:$0xf]  ;;  %v2900_v36 = vld [vmem:[#allocation2 + $0x454] sm:$0xf0] }
  0x7e   :  { %1424 = vmatpush.bf16.msrb.mxu3 %v2324_v46  ;;  %v2916_v46 = vld [vmem:[#allocation2 + $0x4d4] sm:$0xf0]  ;;  %v2053_v29 = vld [vmem:[#allocation2 + $0x178] sm:$0xf0]  ;;  %v1928_v33 = vor.u32 %v2774_v26, %v1925_v27  ;;  %v2770_v40 = vld [vmem:[#allocation2 + $0x4c] sm:$0xf] }
  0x7f   :  { %v2932_v39 = vld [vmem:[#allocation2 + $0x554] sm:$0xf0]  ;;  %v2403_v47 = vld [vmem:[#allocation2 + $0x428] sm:$0xf]  ;;  %v2357_v27 = vld [vmem:[#allocation2 + $0x3d8] sm:$0xf0] }
  0x80   :  { %1386 = vmatpush.bf16.msrb.mxu0 %v1924_v52  ;;  %1399 = vmatpush.bf16.msrb.mxu1 %v2052_v53  ;;  %v2818_v52 = vld [vmem:[#allocation2 + $0x1cc] sm:$0xf]  ;;  %v2101_v53 = vld [vmem:[#allocation2 + $0x1d8] sm:$0xf0]  ;;  %v2531_v49 = vld [vmem:[#allocation2 + $0x528] sm:$0xf] }
  0x81   :  { %1412 = vmatpush.bf16.msrb.mxu2 %v2180_v54  ;;  %v2484_v54 = vor.u32 %v2916_v46, %v2483_v45  ;;  %v2104_v60 = vor.u32 %v2818_v52, %v2101_v53  ;;  %v2928_v51 = vld [vmem:[#allocation2 + $0x534] sm:$0xf0]  ;;  %v2766_v52 = vld [vmem:[#allocation2 + $0x2c] sm:$0xf]  ;;  %v1893_v53 = vld [vmem:[#allocation2 + $0x38] sm:$0xf0] }
  0x82   :  { %1425 = vmatpush.bf16.msrb.mxu3 %v2308_v58  ;;  %v2912_v58 = vld [vmem:[#allocation2 + $0x4b4] sm:$0xf0]  ;;  %v2532_v59 = vor.u32 %v2928_v51, %v2531_v49  ;;  %v2515_v61 = vld [vmem:[#allocation2 + $0x508] sm:$0xf]  ;;  %v2842_v49 = vld [vmem:[#allocation2 + $0x28c] sm:$0xf] }
  0x83   :  { %v2924_v62 = vld [vmem:[#allocation2 + $0x514] sm:$0xf0]  ;;  %v2874_v51 = vld [vmem:[#allocation2 + $0x38c] sm:$0xf] }
  0x84   :  { %1387 = vmatpush.bf16.msrb.mxu0 %v1908_v0  ;;  %1400 = vmatpush.bf16.msrb.mxu1 %v2036_v1  ;;  %v2814_v0 = vld [vmem:[#allocation2 + $0x1ac] sm:$0xf]  ;;  %v2085_v1 = vld [vmem:[#allocation2 + $0x1b8] sm:$0xf0] }
  0x85   :  { %1413 = vmatpush.bf16.msrb.mxu2 %v2164_v2  ;;  %v2468_v2 = vor.u32 %v2912_v58, %v2467_v57  ;;  %v2088_v10 = vor.u32 %v2814_v0, %v2085_v1  ;;  %v2387_v57 = vld [vmem:[#allocation2 + $0x408] sm:$0xf]  ;;  %v2892_v58 = vld [vmem:[#allocation2 + $0x414] sm:$0xf0]  ;;  %v1877_v1 = vld [vmem:[#allocation2 + $0x18] sm:$0xf0] }
  0x86   :  { %1426 = vmatpush.bf16.msrb.mxu3 %v2292_v6  ;;  %v2908_v6 = vld [vmem:[#allocation2 + $0x494] sm:$0xf0] }
  0x87   :  { %v2452_v17 = vor.u32 %v2908_v6, %v2451_v5  ;;  %v2245_v5 = vld [vmem:[#allocation2 + $0x2f8] sm:$0xf0]  ;;  %v2886_v6 = vld [vmem:[#allocation2 + $0x3ec] sm:$0xf] }
  0x88   :  { %1388 = vmatpush.bf16.msrb.mxu0 %v1892_v14  ;;  %1401 = vmatpush.bf16.msrb.mxu1 %v2020_v18  ;;  %v2810_v14 = vld [vmem:[#allocation2 + $0x18c] sm:$0xf]  ;;  %v2580_v18 = vor.u32 %v2940_v11, %v2579_v7  ;;  %v2388_v7 = vor.u32 %v2892_v58, %v2387_v57 }
  0x89   :  { %1414 = vmatpush.bf16.msrb.mxu2 %v2148_v19  ;;  %v1944_v19 = vor.u32 %v2778_v12, %v1941_v13  ;;  %v2918_v11 = vld [vmem:[#allocation2 + $0x4ec] sm:$0xf]  ;;  %v2501_v12 = vld [vmem:[#allocation2 + $0x4f8] sm:$0xf0]  ;;  %v2516_v13 = vor.u32 %v2924_v62, %v2515_v61 }
  0x8a   :  { %1427 = vmatpush.bf16.msrb.mxu3 %v2276_v23  ;;  %v2072_v23 = vor.u32 %v2810_v14, %v2069_v16  ;;  %v1880_v14 = vor.u32 %v2762_v63, %v1877_v1  ;;  %v2950_v16 = vld [vmem:[#allocation2 + $0x5ec] sm:$0xf]  ;;  %v2504_v21 = vor.u32 %v2918_v11, %v2501_v12  ;;  %v2309_v63 = vld [vmem:[#allocation2 + $0x378] sm:$0xf0] }
  0x8b   :  { %v2870_v61 = vld [vmem:[#allocation2 + $0x36c] sm:$0xf]  ;;  %v2437_v1 = vld [vmem:[#allocation2 + $0x478] sm:$0xf0] }
  0x8c   :  { %1389 = vmatpush.bf16.msrb.mxu0 %v1876_v31  ;;  %1402 = vmatpush.bf16.msrb.mxu1 %v2004_v37  ;;  %v2564_v31 = vor.u32 %v2936_v24, %v2563_v22  ;;  %v2547_v37 = vld [vmem:[#allocation2 + $0x548] sm:$0xf]  ;;  %v2850_v22 = vld [vmem:[#allocation2 + $0x2cc] sm:$0xf]  ;;  %v2165_v11 = vld [vmem:[#allocation2 + $0x258] sm:$0xf0] }
  0x8d   :  { %1415 = vmatpush.bf16.msrb.mxu2 %v2132_v38  ;;  %v2056_v38 = vor.u32 %v2806_v28, %v2053_v29  ;;  %v2548_v45 = vor.u32 %v2932_v39, %v2547_v37  ;;  %v2882_v24 = vld [vmem:[#allocation2 + $0x3cc] sm:$0xf]  ;;  %v2485_v29 = vld [vmem:[#allocation2 + $0x4d8] sm:$0xf0] }
  0x8e   :  { %1428 = vmatpush.bf16.msrb.mxu3 %v2260_v41  ;;  %v1909_v41 = vld [vmem:[#allocation2 + $0x58] sm:$0xf0]  ;;  %v2914_v28 = vld [vmem:[#allocation2 + $0x4cc] sm:$0xf] }
  0x8f   :  { %1390 = vmatmul.bf16.vlgmr.msrb.gmra.mxu0 %v3094_v9  ;;  %1403 = vmatmul.bf16.vlgmr.msrb.gmra.mxu1 %v3107_v25  ;;  %v1912_v46 = vor.u32 %v2770_v40, %v1909_v41  ;;  %v2846_v37 = vld [vmem:[#allocation2 + $0x2ac] sm:$0xf]  ;;  %v2341_v41 = vld [vmem:[#allocation2 + $0x3b8] sm:$0xf0] }
  0x90   :  { %1434 = vmatpush.bf16.msra.mxu0 %v2500_v42  ;;  %1447 = vmatpush.bf16.msra.mxu1 %v2628_v43  ;;  %v2802_v42 = vld [vmem:[#allocation2 + $0x14c] sm:$0xf]  ;;  %v2037_v43 = vld [vmem:[#allocation2 + $0x158] sm:$0xf0] }
  0x91   :  { %1460 = vmatpush.bf16.msra.mxu2 %v1992_v44  ;;  %1429 = vmatmul.bf16.vlgmr.msrb.gmra.mxu3 %v3099_v15  ;;  %v2420_v44 = vor.u32 %v2900_v36, %v2419_v34  ;;  %v2040_v50 = vor.u32 %v2802_v42, %v2037_v43  ;;  %v2360_v34 = vor.u32 %v2882_v24, %v2357_v27  ;;  %v2878_v39 = vld [vmem:[#allocation2 + $0x3ac] sm:$0xf]  ;;  %v2469_v43 = vld [vmem:[#allocation2 + $0x4b8] sm:$0xf0] }
  0x92   :  { %1473 = vmatpush.bf16.msra.mxu3 %v2120_v48  ;;  %1416 = vmatmul.bf16.vlgmr.msrb.gmra.mxu2 %v3092_v8  ;;  %v2896_v48 = vld [vmem:[#allocation2 + $0x434] sm:$0xf0]  ;;  %v2488_v36 = vor.u32 %v2914_v28, %v2485_v29  ;;  %v2910_v42 = vld [vmem:[#allocation2 + $0x4ac] sm:$0xf]  ;;  %v2277_v29 = vld [vmem:[#allocation2 + $0x338] sm:$0xf0] }
  0x93   :  { %v2866_v12 = vld [vmem:[#allocation2 + $0x34c] sm:$0xf] }
  0x94   :  { %1435 = vmatpush.bf16.msra.mxu0 %v2484_v54  ;;  %1448 = vmatpush.bf16.msra.mxu1 %v2612_v55  ;;  %v2798_v54 = vld [vmem:[#allocation2 + $0x12c] sm:$0xf]  ;;  %v2021_v55 = vld [vmem:[#allocation2 + $0x138] sm:$0xf0] }
  0x95   :  { %1461 = vmatpush.bf16.msra.mxu2 %v1976_v56  ;;  %v2404_v56 = vor.u32 %v2896_v48, %v2403_v47  ;;  %v2024_v0 = vor.u32 %v2798_v54, %v2021_v55  ;;  %v2344_v47 = vor.u32 %v2878_v39, %v2341_v41  ;;  %v2472_v48 = vor.u32 %v2910_v42, %v2469_v43  ;;  %v2906_v54 = vld [vmem:[#allocation2 + $0x48c] sm:$0xf]  ;;  %v2453_v55 = vld [vmem:[#allocation2 + $0x498] sm:$0xf0] }
  0x96   :  { %1474 = vmatpush.bf16.msra.mxu3 %v2104_v60  ;;  %v1896_v60 = vor.u32 %v2766_v52, %v1893_v53  ;;  %v2325_v53 = vld [vmem:[#allocation2 + $0x398] sm:$0xf0]  ;;  %v2830_v24 = vld [vmem:[#allocation2 + $0x22c] sm:$0xf] }
  0x97   :  { %v2328_v58 = vor.u32 %v2874_v51, %v2325_v53  ;;  %v2862_v27 = vld [vmem:[#allocation2 + $0x32c] sm:$0xf]  ;;  %v2133_v43 = vld [vmem:[#allocation2 + $0x218] sm:$0xf0] }
  0x98   :  { %1436 = vmatpush.bf16.msra.mxu0 %v2468_v2  ;;  %1449 = vmatpush.bf16.msra.mxu1 %v2596_v3  ;;  %v2794_v2 = vld [vmem:[#allocation2 + $0x10c] sm:$0xf]  ;;  %v2005_v3 = vld [vmem:[#allocation2 + $0x118] sm:$0xf0] }
  0x99   :  { %1462 = vmatpush.bf16.msra.mxu2 %v1960_v4  ;;  %v2854_v4 = vld [vmem:[#allocation2 + $0x2ec] sm:$0xf] }
  0x9a   :  { %1475 = vmatpush.bf16.msra.mxu3 %v2088_v10  ;;  %v2373_v10 = vld [vmem:[#allocation2 + $0x3f8] sm:$0xf0]  ;;  %v2826_v42 = vld [vmem:[#allocation2 + $0x20c] sm:$0xf] }
  0x9b   :  { %v2376_v20 = vor.u32 %v2886_v6, %v2373_v10  ;;  %v2312_v6 = vor.u32 %v2870_v61, %v2309_v63  ;;  %v2834_v10 = vld [vmem:[#allocation2 + $0x24c] sm:$0xf]  ;;  %v2136_v51 = vor.u32 %v2826_v42, %v2133_v43  ;;  %v2972_v42 = vld [vmem:[#allocation4 + $0x98] sm:$0xff] }
  0x9c   :  { %1437 = vmatpush.bf16.msra.mxu0 %v2452_v17  ;;  %1450 = vmatpush.bf16.msra.mxu1 %v2580_v18  ;;  %v2629_v17 = vld [vmem:[#allocation2 + $0x5f8] sm:$0xf0]  ;;  %v2008_v18 = vor.u32 %v2794_v2, %v2005_v3  ;;  %v2934_v2 = vld [vmem:[#allocation2 + $0x56c] sm:$0xf] }
  0x9d   :  { %1463 = vmatpush.bf16.msra.mxu2 %v1944_v19  ;;  %v2248_v19 = vor.u32 %v2854_v4, %v2245_v5  ;;  %v2632_v26 = vor.u32 %v2950_v16, %v2629_v17  ;;  %v2565_v3 = vld [vmem:[#allocation2 + $0x578] sm:$0xf0]  ;;  %v2898_v16 = vld [vmem:[#allocation2 + $0x44c] sm:$0xf] }
  0x9e   :  { %1476 = vmatpush.bf16.msra.mxu3 %v2072_v23  ;;  %v2229_v23 = vld [vmem:[#allocation2 + $0x2d8] sm:$0xf0]  ;;  %v2958_v63 = vld [vmem:[#allocation4 + $0x28] sm:$0xff] }
  0x9f   :  { %v2421_v17 = vld [vmem:[#allocation2 + $0x458] sm:$0xf0] }
  0xa0   :  { %1438 = vmatpush.bf16.msra.mxu0 %v2436_v30  ;;  %1451 = vmatpush.bf16.msra.mxu1 %v2564_v31  ;;  %v2946_v30 = vld [vmem:[#allocation2 + $0x5cc] sm:$0xf]  ;;  %v2613_v31 = vld [vmem:[#allocation2 + $0x5d8] sm:$0xf0] }
  0xa1   :  { %1464 = vmatpush.bf16.msra.mxu2 %v1928_v33  ;;  %v2232_v33 = vor.u32 %v2850_v22, %v2229_v23  ;;  %v2616_v40 = vor.u32 %v2946_v30, %v2613_v31  ;;  %v2424_v23 = vor.u32 %v2898_v16, %v2421_v17  ;;  %v2894_v30 = vld [vmem:[#allocation2 + $0x42c] sm:$0xf]  ;;  %v2405_v31 = vld [vmem:[#allocation2 + $0x438] sm:$0xf0] }
  0xa2   :  { %1477 = vmatpush.bf16.msra.mxu3 %v2056_v38  ;;  %v2213_v38 = vld [vmem:[#allocation2 + $0x2b8] sm:$0xf0]  ;;  %v2408_v41 = vor.u32 %v2894_v30, %v2405_v31  ;;  %v2954_v16 = vld [vmem:[#allocation4 + $0x8] sm:$0xff] }
  0xa3   :  { %v2976_v17 = vld [vmem:[#allocation4 + $0xb8] sm:$0xff] }
  0xa4   :  { %1439 = vmatpush.bf16.msra.mxu0 %v2420_v44  ;;  %1452 = vmatpush.bf16.msra.mxu1 %v2548_v45  ;;  %v2942_v44 = vld [vmem:[#allocation2 + $0x5ac] sm:$0xf]  ;;  %v2597_v45 = vld [vmem:[#allocation2 + $0x5b8] sm:$0xf0] }
  0xa5   :  { %1465 = vmatpush.bf16.msra.mxu2 %v1912_v46  ;;  %v2216_v46 = vor.u32 %v2846_v37, %v2213_v38  ;;  %v2600_v52 = vor.u32 %v2942_v44, %v2597_v45  ;;  %v2858_v44 = vld [vmem:[#allocation2 + $0x30c] sm:$0xf] }
  0xa6   :  { %1478 = vmatpush.bf16.msra.mxu3 %v2040_v50  ;;  %v2197_v50 = vld [vmem:[#allocation2 + $0x298] sm:$0xf0] }
  0xa7   :  { %v2200_v57 = vor.u32 %v2842_v49, %v2197_v50  ;;  %v2922_v49 = vld [vmem:[#allocation2 + $0x50c] sm:$0xf]  ;;  %v2517_v50 = vld [vmem:[#allocation2 + $0x518] sm:$0xf0] }
  0xa8   :  { %1440 = vmatpush.bf16.msra.mxu0 %v2404_v56  ;;  %1453 = vmatpush.bf16.msra.mxu1 %v2532_v59  ;;  %v2938_v56 = vld [vmem:[#allocation2 + $0x58c] sm:$0xf] }
  0xa9   :  { %1466 = vmatpush.bf16.msra.mxu2 %v1896_v60  ;;  %v2838_v59 = vld [vmem:[#allocation2 + $0x26c] sm:$0xf]  ;;  %v2181_v60 = vld [vmem:[#allocation2 + $0x278] sm:$0xf0] }
  0xaa   :  { %1479 = vmatpush.bf16.msra.mxu3 %v2024_v0  ;;  %v2902_v0 = vld [vmem:[#allocation2 + $0x46c] sm:$0xf]  ;;  %v2184_v4 = vor.u32 %v2838_v59, %v2181_v60  ;;  %v2968_v59 = vld [vmem:[#allocation4 + $0x78] sm:$0xff]  ;;  %v2959_v60 = vld [vmem:[#allocation4 + $0x30] sm:$0xff] }
  0xac   :  { %1441 = vmatpush.bf16.msra.mxu0 %v2388_v7  ;;  %1454 = vmatpush.bf16.msra.mxu1 %v2516_v13  ;;  %v2440_v7 = vor.u32 %v2902_v0, %v2437_v1  ;;  %v2568_v13 = vor.u32 %v2934_v2, %v2565_v3  ;;  %v2966_v1 = vld [vmem:[#allocation4 + $0x68] sm:$0xff]  ;;  %v2957_v3 = vld [vmem:[#allocation4 + $0x20] sm:$0xff] }
  0xad   :  { %1467 = vmatpush.bf16.msra.mxu2 %v1880_v14  ;;  %v2293_v14 = vld [vmem:[#allocation2 + $0x358] sm:$0xf0] }
  0xae   :  { %1480 = vmatpush.bf16.msra.mxu3 %v2008_v18  ;;  %v2930_v18 = vld [vmem:[#allocation2 + $0x54c] sm:$0xf]  ;;  %v2296_v22 = vor.u32 %v2866_v12, %v2293_v14  ;;  %v2963_v14 = vld [vmem:[#allocation4 + $0x50] sm:$0xff] }
  0xaf   :  { %1442 = vmatmul.bf16.vlgmr.msra.gmra.mxu0 %v3116_v32  ;;  %1455 = vmatmul.bf16.vlgmr.msra.gmra.mxu1 %v3118_v35 }
  0xb0   :  { %1486 = vmatpush.bf16.msrb.mxu0 %v2248_v19  ;;  %1499 = vmatpush.bf16.msrb.mxu1 %v2376_v20  ;;  %v2549_v19 = vld [vmem:[#allocation2 + $0x558] sm:$0xf0]  ;;  %v2168_v20 = vor.u32 %v2834_v10, %v2165_v11  ;;  %v2955_v11 = vld [vmem:[#allocation4 + $0x10] sm:$0xff] }
  0xb1   :  { %1512 = vmatpush.bf16.msrb.mxu2 %v2504_v21  ;;  %1481 = vmatmul.bf16.vlgmr.msra.gmra.mxu3 %v3107_v25  ;;  %v2456_v25 = vor.u32 %v2906_v54, %v2453_v55  ;;  %v3138_v21 = vpop.f32.mrf.mxu1  ;;  %v2552_v28 = vor.u32 %v2930_v18, %v2549_v19  ;;  %v2962_v19 = vld [vmem:[#allocation4 + $0x48] sm:$0xff] }
  0xb2   :  { %1525 = vmatpush.bf16.msrb.mxu3 %v2632_v26  ;;  %1468 = vmatmul.bf16.vlgmr.msra.gmra.mxu2 %v3094_v9  ;;  %v2581_v9 = vld [vmem:[#allocation2 + $0x598] sm:$0xf0] }
  0xb3   :  { %v2584_v62 = vor.u32 %v2938_v56, %v2581_v9  ;;  %v2149_v26 = vld [vmem:[#allocation2 + $0x238] sm:$0xf0]  ;;  %v2520_v56 = vor.u32 %v2922_v49, %v2517_v50 }
  0xb4   :  { %1487 = vmatpush.bf16.msrb.mxu0 %v2232_v33  ;;  %1500 = vmatpush.bf16.msrb.mxu1 %v2360_v34  ;;  %v3136_v5 = vpop.f32.mrf.mxu0  ;;  %v2926_v34 = vld [vmem:[#allocation2 + $0x52c] sm:$0xf]  ;;  %v1274_v37 = vpop.f32.mrf.mxu3  ;;  %v2152_v38 = vor.u32 %v2830_v24, %v2149_v26  ;;  %v2960_v9 = vld [vmem:[#allocation4 + $0x38] sm:$0xff]  ;;  %v2961_v26 = vld [vmem:[#allocation4 + $0x40] sm:$0xff] }
  0xb5   :  { %1513 = vmatpush.bf16.msrb.mxu2 %v2488_v36  ;;  %v2533_v36 = vld [vmem:[#allocation2 + $0x538] sm:$0xf0] }
  0xb6   :  { %1526 = vmatpush.bf16.msrb.mxu3 %v2616_v40  ;;  %v2280_v40 = vor.u32 %v2862_v27, %v2277_v29  ;;  %v2536_v45 = vor.u32 %v2926_v34, %v2533_v36 }
  0xb8   :  { %1488 = vmatpush.bf16.msrb.mxu0 %v2216_v46  ;;  %1501 = vmatpush.bf16.msrb.mxu1 %v2344_v47  ;;  %v2261_v46 = vld [vmem:[#allocation2 + $0x318] sm:$0xf0]  ;;  %v2890_v47 = vld [vmem:[#allocation2 + $0x40c] sm:$0xf] }
  0xb9   :  { %1514 = vmatpush.bf16.msrb.mxu2 %v2472_v48  ;;  %v1261_v33 = vpop.f32.mrf.mxu2  ;;  %v2389_v48 = vld [vmem:[#allocation2 + $0x418] sm:$0xf0]  ;;  %v1250_v53 = vpop.f32.mrf.mxu1  ;;  %v2264_v54 = vor.u32 %v2858_v44, %v2261_v46 }
  0xba   :  { %1527 = vmatpush.bf16.msrb.mxu3 %v2600_v52  ;;  %v3143_v52 = vld [vmem:[%s3163_s2] sm:$0xf]  ;;  %v2392_v55 = vor.u32 %v2890_v47, %v2389_v48  ;;  %v2971_v47 = vld [vmem:[#allocation4 + $0x90] sm:$0xff]  ;;  %v2970_v53 = vld [vmem:[#allocation4 + $0x88] sm:$0xff] }
  0xbb   :  { %v259_v27 = vperm.slane %v3143_v52, 1 }
  0xbc   :  { %1489 = vmatpush.bf16.msrb.mxu0 %v2200_v57  ;;  %1502 = vmatpush.bf16.msrb.mxu1 %v2328_v58  ;;  %v1237_v39 = vpop.f32.mrf.mxu0  ;;  %v258_v58 = vperm.slane %v3143_v52, 0 }
  0xbd   :  { %1515 = vmatpush.bf16.msrb.mxu2 %v2456_v25  ;;  %v1276_v25 = vpop.f32.mrf.mxu3 }
  0xbe   :  { %1528 = vmatpush.bf16.msrb.mxu3 %v2584_v62  ;;  %v1236_v61 = vadd.f32 %v3136_v5, %v258_v58  ;;  %v2967_v62 = vld [vmem:[#allocation4 + $0x70] sm:$0xff]  ;;  %v2965_v5 = vld [vmem:[#allocation4 + $0x60] sm:$0xff]  ;;  %v2984_v58 = vld [vmem:[#allocation4 + $0xf8] sm:$0xff] }
  0xc0   :  { %1490 = vmatpush.bf16.msrb.mxu0 %v2184_v4  ;;  %1503 = vmatpush.bf16.msrb.mxu1 %v2312_v6  ;;  %v1249_v0 = vadd.f32 %v3138_v21, %v1236_v61  ;;  %v2956_v6 = vld [vmem:[#allocation4 + $0x18] sm:$0xff]  ;;  %v2975_v21 = vld [vmem:[#allocation4 + $0xb0] sm:$0xff]  ;;  %v2982_v61 = vld [vmem:[#allocation4 + $0xe8] sm:$0xff] }
  0xc1   :  { %1516 = vmatpush.bf16.msrb.mxu2 %v2440_v7  ;;  %v1263_v57 = vpop.f32.mrf.mxu2 }
  0xc2   :  { %1529 = vmatpush.bf16.msrb.mxu3 %v2568_v13  ;;  %v1262_v4 = vadd.f32 %v1261_v33, %v1249_v0  ;;  %v2974_v33 = vld [vmem:[#allocation4 + $0xa8] sm:$0xff] }
  0xc4   :  { %1491 = vmatpush.bf16.msrb.mxu0 %v2168_v20  ;;  %1504 = vmatpush.bf16.msrb.mxu1 %v2296_v22 }
  0xc5   :  { %1517 = vmatpush.bf16.msrb.mxu2 %v2424_v23  ;;  %v2953_v23 = vld [vmem:[#allocation4] sm:$0xff] }
  0xc6   :  { %1530 = vmatpush.bf16.msrb.mxu3 %v2552_v28 }
  0xc8   :  { %1492 = vmatpush.bf16.msrb.mxu0 %v2152_v38  ;;  %1505 = vmatpush.bf16.msrb.mxu1 %v2280_v40 }
  0xc9   :  { %1518 = vmatpush.bf16.msrb.mxu2 %v2408_v41 }
  0xca   :  { %1531 = vmatpush.bf16.msrb.mxu3 %v2536_v45 }
  0xcc   :  { %1493 = vmatpush.bf16.msrb.mxu0 %v2136_v51  ;;  %1506 = vmatpush.bf16.msrb.mxu1 %v2264_v54  ;;  %v1287_v2 = vpop.f32.mrf.mxu0 }
  0xcd   :  { %1519 = vmatpush.bf16.msrb.mxu2 %v2392_v55  ;;  %v2969_v55 = vld [vmem:[#allocation4 + $0x80] sm:$0xff] }
  0xce   :  { %1532 = vmatpush.bf16.msrb.mxu3 %v2520_v56 }
  0xcf   :  { %1494 = vmatmul.bf16.vlgmr.msrb.gmra.mxu0 %v3092_v8  ;;  %1507 = vmatmul.bf16.vlgmr.msrb.gmra.mxu1 %v3099_v15  ;;  %v1300_v8 = vpop.f32.mrf.mxu1  ;;  %v1275_v15 = vadd.f32 %v1274_v37, %v1262_v4  ;;  %v2973_v37 = vld [vmem:[#allocation4 + $0xa0] sm:$0xff]  ;;  %v2980_v4 = vld [vmem:[#allocation4 + $0xd8] sm:$0xff] }
  0xd0   :  { %1806 = vmatpush.bf16.msra.mxu0 %v2960_v9  ;;  %1819 = vmatpush.bf16.msra.mxu1 %v2968_v59  ;;  %v2983_v59 = vld [vmem:[#allocation4 + $0xf0] sm:$0xff] }
  0xd1   :  { %1520 = vmatmul.bf16.vlgmr.msrb.gmra.mxu2 %v3116_v32  ;;  %1533 = vmatmul.bf16.vlgmr.msrb.gmra.mxu3 %v3118_v35  ;;  %v2964_v32 = vld [vmem:[#allocation4 + $0x58] sm:$0xff]  ;;  %v1288_v13 = vadd.f32 %v1287_v2, %v1275_v15 }
  0xd2   :  { %1832 = vmatpush.bf16.msra.mxu2 %v2976_v17  ;;  %1845 = vmatpush.bf16.msra.mxu3 %v2984_v58  ;;  %v2977_v17 = vld [vmem:[#allocation4 + $0xc0] sm:$0xff] }
  0xd3   :  { %v1301_v18 = vadd.f32 %v1300_v8, %v1288_v13 }
  0xd4   :  { %1807 = vmatpush.bf16.msra.mxu0 %v2959_v60  ;;  %1820 = vmatpush.bf16.msra.mxu1 %v2967_v62  ;;  %v1326_v35 = vpop.f32.mrf.mxu3  ;;  %v1289_v10 = vpop.f32.mrf.mxu0  ;;  %v260_v60 = vperm.slane %v3143_v52, 2 }
  0xd5   :  { %v1313_v7 = vpop.f32.mrf.mxu2  ;;  %v1538_v24 = vmax.f32 %v1301_v18, 0.0  ;;  %v2978_v10 = vld [vmem:[#allocation4 + $0xc8] sm:$0xff] }
  0xd6   :  { %1833 = vmatpush.bf16.msra.mxu2 %v2975_v21  ;;  %v1314_v29 = vadd.f32 %v1313_v7, %v259_v27  ;;  %1846 = vmatpush.bf16.msra.mxu3 %v2983_v59 }
  0xd7   :  { %v1302_v12 = vpop.f32.mrf.mxu1  ;;  %v1542_v28 = vpack.c.bf16 %v1538_v24, %v1538_v24 }
  0xd8   :  { %1808 = vmatpush.bf16.msra.mxu0 %v2958_v63  ;;  %1821 = vmatpush.bf16.msra.mxu1 %v2966_v1  ;;  %v1327_v30 = vadd.f32 %v1326_v35, %v1314_v29  ;;  %v2981_v1 = vld [vmem:[#allocation4 + $0xe0] sm:$0xff] }
  0xda   :  { %1834 = vmatpush.bf16.msra.mxu2 %v2974_v33  ;;  %1847 = vmatpush.bf16.msra.mxu3 %v2982_v61 }
  0xdc   :  { %1809 = vmatpush.bf16.msra.mxu0 %v2957_v3  ;;  %1822 = vmatpush.bf16.msra.mxu1 %v2965_v5  ;;  %v1328_v22 = vpop.f32.mrf.mxu3 }
  0xdd   :  { %v1315_v20 = vpop.f32.mrf.mxu2 }
  0xde   :  { %1835 = vmatpush.bf16.msra.mxu2 %v2973_v37  ;;  %1848 = vmatpush.bf16.msra.mxu3 %v2981_v1  ;;  %v261_v20 = vperm.slane %v3143_v52, 3  ;;  %v2991_v52 = vld [vmem:[%s3165_s4] ss:$0 sm:$0xff] }
  0xe0   :  { %1810 = vmatpush.bf16.msra.mxu0 %v2956_v6  ;;  %1823 = vmatpush.bf16.msra.mxu1 %v2964_v32  ;;  %v2979_v6 = vld [vmem:[#allocation4 + $0xd0] sm:$0xff] }
  0xe2   :  { %1836 = vmatpush.bf16.msra.mxu2 %v2972_v42  ;;  %1849 = vmatpush.bf16.msra.mxu3 %v2980_v4 }
  0xe4   :  { %1811 = vmatpush.bf16.msra.mxu0 %v2955_v11  ;;  %1824 = vmatpush.bf16.msra.mxu1 %v2963_v14 }
  0xe6   :  { %1837 = vmatpush.bf16.msra.mxu2 %v2971_v47  ;;  %1850 = vmatpush.bf16.msra.mxu3 %v2979_v6 }
  0xe8   :  { %1812 = vmatpush.bf16.msra.mxu0 %v2954_v16  ;;  %1825 = vmatpush.bf16.msra.mxu1 %v2962_v19 }
  0xea   :  { %1838 = vmatpush.bf16.msra.mxu2 %v2970_v53  ;;  %1851 = vmatpush.bf16.msra.mxu3 %v2978_v10 }
  0xec   :  { %1813 = vmatpush.bf16.msra.mxu0 %v2953_v23  ;;  %1826 = vmatpush.bf16.msra.mxu1 %v2961_v26  ;;  %v1339_v31 = vpop.f32.mrf.mxu0  ;;  %v1352_v36 = vpop.f32.mrf.mxu1 }
  0xed   :  { %v1340_v34 = vadd.f32 %v1339_v31, %v1327_v30 }
  0xee   :  { %1839 = vmatpush.bf16.msra.mxu2 %v2969_v55  ;;  %1852 = vmatpush.bf16.msra.mxu3 %v2977_v17 }
  0xef   :  { %1814 = vmatmul.bf16.vlgmr.msra.gmra.mxu0 %v1542_v28  ;;  %v1353_v38 = vadd.f32 %v1352_v36, %v1340_v34 }
  0xf4   :  { %v1378_v41 = vpop.f32.mrf.mxu3  ;;  %v1341_v44 = vpop.f32.mrf.mxu0 }
  0xf5   :  { %v1365_v39 = vpop.f32.mrf.mxu2  ;;  %v1354_v45 = vpop.f32.mrf.mxu1 }
  0xf6   :  { %v1366_v40 = vadd.f32 %v1365_v39, %v1353_v38 }
  0xf8   :  { %v1379_v43 = vadd.f32 %v1378_v41, %v1366_v40 }
  0xfa   :  { %v1539_v46 = vmax.f32 %v1379_v43, 0.0 }
  0xfc   :  { %v1543_v48 = vpack.c.bf16 %v1539_v46, %v1539_v46  ;;  %v1380_v50 = vpop.f32.mrf.mxu3 }
  0xfd   :  { %v1367_v49 = vpop.f32.mrf.mxu2 }
  0xfe   :  { %1827 = vmatmul.bf16.vlgmr.msra.gmra.mxu1 %v1543_v48 }
 0x10c   :  { %v1391_v51 = vpop.f32.mrf.mxu0  ;;  %v1404_v54 = vpop.f32.mrf.mxu1 }
 0x10d   :  { %v1392_v62 = vadd.f32 %v1391_v51, %v260_v60 }
 0x10f   :  { %v1405_v2 = vadd.f32 %v1404_v54, %v1392_v62 }
 0x114   :  { %v1393_v9 = vpop.f32.mrf.mxu0  ;;  %v1430_v57 = vpop.f32.mrf.mxu3 }
 0x115   :  { %v1417_v56 = vpop.f32.mrf.mxu2  ;;  %v1406_v25 = vpop.f32.mrf.mxu1 }
 0x116   :  { %v1418_v3 = vadd.f32 %v1417_v56, %v1405_v2 }
 0x118   :  { %v1431_v8 = vadd.f32 %v1430_v57, %v1418_v3 }
 0x11c   :  { %v1432_v0 = vpop.f32.mrf.mxu3 }
 0x11d   :  { %v1419_v63 = vpop.f32.mrf.mxu2 }
 0x12c   :  { %v1443_v5 = vpop.f32.mrf.mxu0  ;;  %v1456_v32 = vpop.f32.mrf.mxu1 }
 0x12d   :  { %v1444_v15 = vadd.f32 %v1443_v5, %v1431_v8 }
 0x12f   :  { %v1457_v7 = vadd.f32 %v1456_v32, %v1444_v15 }
 0x131   :  { %v1540_v35 = vmax.f32 %v1457_v7, 0.0 }
 0x133   :  { %v1544_v11 = vpack.c.bf16 %v1540_v35, %v1540_v35 }
 0x134   :  { %v1482_v13 = vpop.f32.mrf.mxu3  ;;  %v1445_v14 = vpop.f32.mrf.mxu0 }
 0x135   :  { %v1469_v12 = vpop.f32.mrf.mxu2  ;;  %1840 = vmatmul.bf16.vlgmr.msra.gmra.mxu2 %v1544_v11  ;;  %v1458_v16 = vpop.f32.mrf.mxu1 }
 0x136   :  { %v1470_v21 = vadd.f32 %v1469_v12, %v261_v20 }
 0x138   :  { %v1483_v22 = vadd.f32 %v1482_v13, %v1470_v21 }
 0x13c   :  { %v1484_v19 = vpop.f32.mrf.mxu3 }
 0x13d   :  { %v1471_v18 = vpop.f32.mrf.mxu2 }
 0x14c   :  { %v1495_v23 = vpop.f32.mrf.mxu0  ;;  %v1508_v24 = vpop.f32.mrf.mxu1 }
 0x14d   :  { %v1496_v26 = vadd.f32 %v1495_v23, %v1483_v22 }
 0x14f   :  { %v1509_v27 = vadd.f32 %v1508_v24, %v1496_v26 }
 0x154   :  { %v1521_v28 = vpop.f32.mrf.mxu2  ;;  %v1534_v30 = vpop.f32.mrf.mxu3 }
 0x155   :  { %v1522_v29 = vadd.f32 %v1521_v28, %v1509_v27  ;;  %v1497_v31 = vpop.f32.mrf.mxu0  ;;  %v1510_v33 = vpop.f32.mrf.mxu1 }
 0x157   :  { %v1535_v34 = vadd.f32 %v1534_v30, %v1522_v29 }
 0x159   :  { %v1541_v36 = vmax.f32 %v1535_v34, 0.0 }
 0x15b   :  { %v1545_v37 = vpack.c.bf16 %v1541_v36, %v1541_v36 }
 0x15c   :  { %v1523_v38 = vpop.f32.mrf.mxu2  ;;  %v1536_v39 = vpop.f32.mrf.mxu3 }
 0x15d   :  { %1853 = vmatmul.bf16.vlgmr.msra.gmra.mxu3 %v1545_v37 }
 0x16c   :  { %v1815_v40 = vpop.f32.mrf.mxu0 }
 0x16d   :  { %v1816_v42 = vadd.f32 %v2991_v52, %v1815_v40 }
 0x174   :  { %v1817_v41 = vpop.f32.mrf.mxu0 }
 0x17b   :  { %v1828_v43 = vpop.f32.mrf.mxu1 }
 0x17c   :  { %v1829_v44 = vadd.f32 %v1828_v43, %v1816_v42 }
 0x183   :  { %v1830_v45 = vpop.f32.mrf.mxu1 }
 0x1b8   :  { %v1841_v46 = vpop.f32.mrf.mxu2 }
 0x1b9   :  { %v1842_v48 = vadd.f32 %v1841_v46, %v1829_v44 }
 0x1c0   :  { %v1843_v47 = vpop.f32.mrf.mxu2 }
 0x1e0   :  { %v1854_v49 = vpop.f32.mrf.mxu3 }
 0x1e1   :  { %v1855_v50 = vadd.f32 %v1854_v49, %v1842_v48 }
 0x1e3   :  { %1858 = vst [vmem:[%s3166_s5] sm:$0xff] %v1855_v50 }
 0x1e8   :  { %v1856_v51 = vpop.f32.mrf.mxu3 }
 0x1e9   :  { %1863 = vsyncpa [#allocation3], 1 }
 0x1ea   :  { %1864 = vsyncpa [#allocation5], 1 }

</bundles_post_ra>
